<compile_context>
chip_gen: v6e
topology: v6e:2x2x1
jax: 0.10.0
libtpu: 0.0.40
codegen_flags: <defaults>
</compile_context>

<pallas_src>
from functools import partial

import jax
import jax.numpy as jnp
import numpy as np
from jax.experimental import pallas as pl
from jax.experimental.pallas import tpu as pltpu


def _logsumexp(r, axis):
    m = jnp.max(r, axis=axis, keepdims=True)
    return m + jnp.log(jnp.sum(jnp.exp(r - m), axis=axis, keepdims=True))


def _perm_kernel(bq_ref, bk_ref, u_ref, out_ref, sq_acc, sk_acc, *,
                 combined_scale, inv_temp, n_iters, eps, log_floor):
    # Grid = (B // TB, S // TS); S axis is innermost / "arbitrary".
    # bq_ref/bk_ref: (TB, TS, N, E)   u_ref/out_ref: (TB, N, N)
    # sq_acc/sk_acc: (TB, N, E) f32 accumulators (persist across the S sweep).
    s_idx = pl.program_id(1)

    @pl.when(s_idx == 0)
    def _():
        sq_acc[...] = jnp.zeros_like(sq_acc)
        sk_acc[...] = jnp.zeros_like(sk_acc)

    # Streamed sum over the averaged axis (torch dim=1), f32 accumulation.
    sq_acc[...] += jnp.sum(bq_ref[...].astype(jnp.float32), axis=1)
    sk_acc[...] += jnp.sum(bk_ref[...].astype(jnp.float32), axis=1)

    @pl.when(s_idx == pl.num_programs(1) - 1)
    def _():
        # R[b,i,j] = mean_q[b,i,:] . mean_k[b,j,:] * S**-0.5
        # (both 1/S mean factors and S**-0.5 folded into combined_scale).
        R = jnp.einsum("bie,bje->bij", sq_acc[...], sk_acc[...],
                       preferred_element_type=jnp.float32) * combined_scale
        R = jnp.maximum(R, 0.0)                       # F.relu

        # gumbel_sinkhorn: (log R + gumbel) / temperature
        u = u_ref[...].astype(jnp.float32)            # uniform in [eps, 1-eps]
        gumbel = -jnp.log(-jnp.log(u + eps) + eps)
        # log_floor only affects exact zeros (where torch would yield NaN);
        # it keeps the Sinkhorn chain finite.
        r = (jnp.log(jnp.maximum(R, log_floor)) + gumbel) * inv_temp

        # sinkhorn_sorting_operator: alternating row / column normalisation.
        for _ in range(n_iters):                      # static, unrolled
            r = r - _logsumexp(r, axis=2)             # torch dim=2 (rows)
            r = r - _logsumexp(r, axis=1)             # torch dim=1 (cols)

        out_ref[...] = jnp.exp(r).astype(out_ref.dtype)


def _largest_divisor_at_most(n, cap):
    for d in range(min(n, cap), 0, -1):
        if n % d == 0:
            return d
    return 1


def _choose_batch_tile(B, cap=8):
    """Largest divisor of B <= cap; prefer keeping >=2 grid steps on the batch
    axis (megacore sharding on v7x) whenever that still allows TB >= 2."""
    divs = [d for d in range(1, min(B, cap) + 1) if B % d == 0]
    two_step = [d for d in divs if B // d >= 2]
    if two_step and max(two_step) >= 2:
        return max(two_step)
    return max(divs)


def attention_perm_matrix(b_q, b_k, *, temperature, sinkhorn_iter,
                          noise_key=None, noise=None, eps=1e-6):
    """b_q, b_k: (B, S, E, N) in the original torch layout
    (batch, averaged dim, embed dim 'e', blocks 'i'/'j').  Returns (B, N, N)."""
    B, S, E, N = b_q.shape
    Bk, Sk, Ek, Nk = b_k.shape
    assert B == Bk and S == Sk and E == Ek and N == Nk

    # Layout plumbing outside the kernel: make the wide embed axis the lane
    # (last) dimension instead of the tiny block count N.
    q = jnp.transpose(b_q, (0, 1, 3, 2))   # (B, S, N, E)
    k = jnp.transpose(b_k, (0, 1, 3, 2))   # (B, S, N, E)

    # Host-side uniform noise keeps the RNG stream testable against a pure-JAX
    # reference; sampled in [eps, 1-eps] so the Gumbel transform is finite.
    # TODO(synk): optional in-kernel pltpu.prng_seed/prng_random_bits path to
    # drop this input stream (changes the RNG stream vs. the reference).
    if noise is None:
        assert noise_key is not None
        noise = jax.random.uniform(noise_key, (B, N, N), dtype=jnp.float32,
                                   minval=eps, maxval=1.0 - eps)

    TB = _choose_batch_tile(B)
    # Bound the per-block VMEM footprint (two inputs, double-buffered).
    itemsize = jnp.dtype(b_q.dtype).itemsize
    budget = 2 << 20                                   # ~2 MiB per input block
    ts_cap = max(1, budget // max(1, TB * N * E * itemsize))
    TS = _largest_divisor_at_most(S, ts_cap)

    combined_scale = float(S) ** (-0.5) / float(S * S)  # folds the two 1/S
    kernel = partial(_perm_kernel,
                     combined_scale=combined_scale,
                     inv_temp=1.0 / float(temperature),
                     n_iters=int(sinkhorn_iter),
                     eps=float(eps),
                     log_floor=1e-30)

    grid = (B // TB, S // TS)
    return pl.pallas_call(
        kernel,
        out_shape=jax.ShapeDtypeStruct((B, N, N), b_q.dtype),
        grid_spec=pltpu.PrefetchScalarGridSpec(
            num_scalar_prefetch=0,
            grid=grid,
            in_specs=[
                pl.BlockSpec((TB, TS, N, E), lambda b, s: (b, s, 0, 0)),
                pl.BlockSpec((TB, TS, N, E), lambda b, s: (b, s, 0, 0)),
                pl.BlockSpec((TB, N, N), lambda b, s: (b, 0, 0)),
            ],
            out_specs=pl.BlockSpec((TB, N, N), lambda b, s: (b, 0, 0)),
            scratch_shapes=[
                pltpu.VMEM((TB, N, E), jnp.float32),
                pltpu.VMEM((TB, N, E), jnp.float32),
            ],
        ),
        compiler_params=pltpu.CompilerParams(
            dimension_semantics=("parallel", "arbitrary")),
    )(q, k, noise)


def _reference(b_q, b_k, u, temperature, n_iters, eps=1e-6, log_floor=1e-30):
    # Pure-JAX mirror of the PyTorch forward (same noise u).
    sq = jnp.mean(b_q, axis=1).transpose(0, 2, 1)
    sk = jnp.mean(b_k, axis=1).transpose(0, 2, 1)
    R = jnp.einsum('bie,bje->bij', sq, sk) * (b_q.shape[1] ** -0.5)
    R = jnp.maximum(R, 0.0)
    g = -jnp.log(-jnp.log(u + eps) + eps)
    r = (jnp.log(jnp.maximum(R, log_floor)) + g) / temperature
    for _ in range(n_iters):
        r = r - jax.scipy.special.logsumexp(r, axis=2, keepdims=True)
        r = r - jax.scipy.special.logsumexp(r, axis=1, keepdims=True)
    return jnp.exp(r)


if __name__ == "__main__":
    B, S, E, N = 2, 8, 32, 8          # batch, averaged dim, embed dim, blocks
    temperature = 0.7
    sinkhorn_iter = 8
    eps = 1e-6

    key = jax.random.PRNGKey(0)
    kq, kk, kn = jax.random.split(key, 3)
    # Positive inputs keep relu(R) > 0 (same regime the module is used in).
    b_q = jax.random.uniform(kq, (B, S, E, N), dtype=jnp.float32)
    b_k = jax.random.uniform(kk, (B, S, E, N), dtype=jnp.float32)
    u = jax.random.uniform(kn, (B, N, N), dtype=jnp.float32,
                           minval=eps, maxval=1.0 - eps)

    out = attention_perm_matrix(b_q, b_k,
                                temperature=temperature,
                                sinkhorn_iter=sinkhorn_iter,
                                noise=u)
    out = jax.block_until_ready(out)

    ref = _reference(b_q, b_k, u, temperature, sinkhorn_iter, eps=eps)

    assert out.shape == (B, N, N)
    np.testing.assert_allclose(np.asarray(out), np.asarray(ref),
                               rtol=1e-3, atol=1e-4)
    print("KERNEL_OK")
</pallas_src>

<mosaic_0001>
module attributes {stable_mosaic.version = 11 : i64} {
  func.func @_perm_kernel(%arg0: i32, %arg1: i32, %arg2: memref<2x8x8x32xf32, #tpu.memory_space<vmem>>, %arg3: memref<2x8x8x32xf32, #tpu.memory_space<vmem>>, %arg4: memref<2x8x8xf32, #tpu.memory_space<vmem>>, %arg5: memref<2x8x8xf32, #tpu.memory_space<vmem>>, %arg6: memref<2x8x32xf32, #tpu.memory_space<vmem>>, %arg7: memref<2x8x32xf32, #tpu.memory_space<vmem>>) attributes {dimension_semantics = [#tpu.dimension_semantics<parallel>, #tpu.dimension_semantics<arbitrary>], iteration_bounds = array<i64: 1, 1>, scalar_prefetch = 0 : i64, scratch_operands = 2 : i64, tpu.core_type = #tpu.core_type<tc>, window_params = [{transform_indices = @transform_0, window_bounds = array<i64: 2, 8, 8, 32>}, {transform_indices = @transform_1, window_bounds = array<i64: 2, 8, 8, 32>}, {transform_indices = @transform_2, window_bounds = array<i64: 2, 8, 8>}, {transform_indices = @transform_3, window_bounds = array<i64: 2, 8, 8>}]} {
    %c0_i32 = arith.constant 0 : i32
    %0 = arith.cmpi eq, %arg1, %c0_i32 : i32
    %1 = arith.extui %0 : i1 to i32
    %c0_i32_0 = arith.constant 0 : i32
    %2 = arith.cmpi ne, %1, %c0_i32_0 : i32
    scf.if %2 {
      %cst_23 = arith.constant 0.000000e+00 : f32
      %16 = vector.broadcast %cst_23 : f32 to vector<2x8x32xf32>
      %c0_24 = arith.constant 0 : index
      %c0_25 = arith.constant 0 : index
      %c0_26 = arith.constant 0 : index
      %17 = vector.load %arg6[%c0_24, %c0_25, %c0_26] : memref<2x8x32xf32, #tpu.memory_space<vmem>>, vector<2x8x32xf32>
      tpu.vector_store %arg6[%c0_24, %c0_25, %c0_26], %16 {strides = array<i32>} : memref<2x8x32xf32, #tpu.memory_space<vmem>>, vector<2x8x32xf32>,
      %cst_27 = arith.constant 0.000000e+00 : f32
      %18 = vector.broadcast %cst_27 : f32 to vector<2x8x32xf32>
      %c0_28 = arith.constant 0 : index
      %c0_29 = arith.constant 0 : index
      %c0_30 = arith.constant 0 : index
      %19 = vector.load %arg7[%c0_28, %c0_29, %c0_30] : memref<2x8x32xf32, #tpu.memory_space<vmem>>, vector<2x8x32xf32>
      tpu.vector_store %arg7[%c0_28, %c0_29, %c0_30], %18 {strides = array<i32>} : memref<2x8x32xf32, #tpu.memory_space<vmem>>, vector<2x8x32xf32>,
    } else {
    }
    %c0 = arith.constant 0 : index
    %c0_1 = arith.constant 0 : index
    %c0_2 = arith.constant 0 : index
    %3 = vector.load %arg6[%c0, %c0_1, %c0_2] : memref<2x8x32xf32, #tpu.memory_space<vmem>>, vector<2x8x32xf32>
    %c0_3 = arith.constant 0 : index
    %c0_4 = arith.constant 0 : index
    %c0_5 = arith.constant 0 : index
    %c0_6 = arith.constant 0 : index
    %4 = vector.load %arg2[%c0_3, %c0_4, %c0_5, %c0_6] : memref<2x8x8x32xf32, #tpu.memory_space<vmem>>, vector<2x8x8x32xf32>
    %cst = arith.constant dense<0.000000e+00> : vector<2x8x32xf32>
    %5 = vector.multi_reduction <add>, %4, %cst [1] : vector<2x8x8x32xf32> to vector<2x8x32xf32>
    %6 = arith.addf %3, %5 : vector<2x8x32xf32>
    %c0_7 = arith.constant 0 : index
    %c0_8 = arith.constant 0 : index
    %c0_9 = arith.constant 0 : index
    %7 = vector.load %arg6[%c0_7, %c0_8, %c0_9] : memref<2x8x32xf32, #tpu.memory_space<vmem>>, vector<2x8x32xf32>
    tpu.vector_store %arg6[%c0_7, %c0_8, %c0_9], %6 {strides = array<i32>} : memref<2x8x32xf32, #tpu.memory_space<vmem>>, vector<2x8x32xf32>,
    %c0_10 = arith.constant 0 : index
    %c0_11 = arith.constant 0 : index
    %c0_12 = arith.constant 0 : index
    %8 = vector.load %arg7[%c0_10, %c0_11, %c0_12] : memref<2x8x32xf32, #tpu.memory_space<vmem>>, vector<2x8x32xf32>
    %c0_13 = arith.constant 0 : index
    %c0_14 = arith.constant 0 : index
    %c0_15 = arith.constant 0 : index
    %c0_16 = arith.constant 0 : index
    %9 = vector.load %arg3[%c0_13, %c0_14, %c0_15, %c0_16] : memref<2x8x8x32xf32, #tpu.memory_space<vmem>>, vector<2x8x8x32xf32>
    %cst_17 = arith.constant dense<0.000000e+00> : vector<2x8x32xf32>
    %10 = vector.multi_reduction <add>, %9, %cst_17 [1] : vector<2x8x8x32xf32> to vector<2x8x32xf32>
    %11 = arith.addf %8, %10 : vector<2x8x32xf32>
    %c0_18 = arith.constant 0 : index
    %c0_19 = arith.constant 0 : index
    %c0_20 = arith.constant 0 : index
    %12 = vector.load %arg7[%c0_18, %c0_19, %c0_20] : memref<2x8x32xf32, #tpu.memory_space<vmem>>, vector<2x8x32xf32>
    tpu.vector_store %arg7[%c0_18, %c0_19, %c0_20], %11 {strides = array<i32>} : memref<2x8x32xf32, #tpu.memory_space<vmem>>, vector<2x8x32xf32>,
    %c0_i32_21 = arith.constant 0 : i32
    %13 = arith.cmpi eq, %arg1, %c0_i32_21 : i32
    %14 = arith.extui %13 : i1 to i32
    %c0_i32_22 = arith.constant 0 : i32
    %15 = arith.cmpi ne, %14, %c0_i32_22 : i32
    scf.if %15 {
      %c0_23 = arith.constant 0 : index
      %c0_24 = arith.constant 0 : index
      %c0_25 = arith.constant 0 : index
      %16 = vector.load %arg6[%c0_23, %c0_24, %c0_25] : memref<2x8x32xf32, #tpu.memory_space<vmem>>, vector<2x8x32xf32>
      %c0_26 = arith.constant 0 : index
      %c0_27 = arith.constant 0 : index
      %c0_28 = arith.constant 0 : index
      %17 = vector.load %arg7[%c0_26, %c0_27, %c0_28] : memref<2x8x32xf32, #tpu.memory_space<vmem>>, vector<2x8x32xf32>
      "tpu.trace_start"() <{level = 10 : i32, message = "bie,bje->bij"}> : () -> ()
      %cst_29 = arith.constant dense<0.000000e+00> : vector<2x8x8xf32>
      %18 = tpu.matmul %16, %17, %cst_29 {dimension_numbers = #tpu.dot_dimension_numbers<[2], [2], [1], [1], [0, 0, 0, 1, 1, 1], [0], [0]>} : vector<2x8x32xf32>, vector<2x8x32xf32>, vector<2x8x8xf32> -> vector<2x8x8xf32>
      "tpu.trace_stop"() : () -> ()
      %cst_30 = arith.constant 0.00552427163 : f32
      %19 = vector.broadcast %cst_30 : f32 to vector<2x8x8xf32>
      %20 = arith.mulf %18, %19 : vector<2x8x8xf32>
      %cst_31 = arith.constant 0.000000e+00 : f32
      %21 = vector.broadcast %cst_31 : f32 to vector<2x8x8xf32>
      %22 = arith.maximumf %20, %21 : vector<2x8x8xf32>
      %c0_32 = arith.constant 0 : index
      %c0_33 = arith.constant 0 : index
      %c0_34 = arith.constant 0 : index
      %23 = vector.load %arg4[%c0_32, %c0_33, %c0_34] : memref<2x8x8xf32, #tpu.memory_space<vmem>>, vector<2x8x8xf32>
      %cst_35 = arith.constant 9.99999997E-7 : f32
      %24 = vector.broadcast %cst_35 : f32 to vector<2x8x8xf32>
      %25 = arith.addf %23, %24 : vector<2x8x8xf32>
      %26 = math.log %25 : vector<2x8x8xf32>
      %cst_36 = arith.constant 0.000000e+00 : f32
      %27 = vector.broadcast %cst_36 : f32 to vector<2x8x8xf32>
      %28 = arith.subf %27, %26 : vector<2x8x8xf32>
      %cst_37 = arith.constant 9.99999997E-7 : f32
      %29 = vector.broadcast %cst_37 : f32 to vector<2x8x8xf32>
      %30 = arith.addf %28, %29 : vector<2x8x8xf32>
      %31 = math.log %30 : vector<2x8x8xf32>
      %cst_38 = arith.constant 0.000000e+00 : f32
      %32 = vector.broadcast %cst_38 : f32 to vector<2x8x8xf32>
      %33 = arith.subf %32, %31 : vector<2x8x8xf32>
      %cst_39 = arith.constant 1.000000e-30 : f32
      %34 = vector.broadcast %cst_39 : f32 to vector<2x8x8xf32>
      %35 = arith.maximumf %22, %34 : vector<2x8x8xf32>
      %36 = math.log %35 : vector<2x8x8xf32>
      %37 = arith.addf %36, %33 : vector<2x8x8xf32>
      %cst_40 = arith.constant 1.42857146 : f32
      %38 = vector.broadcast %cst_40 : f32 to vector<2x8x8xf32>
      %39 = arith.mulf %37, %38 : vector<2x8x8xf32>
      %cst_41 = arith.constant dense<0xFF800000> : vector<2x8xf32>
      %40 = vector.multi_reduction <maximumf>, %39, %cst_41 [2] : vector<2x8x8xf32> to vector<2x8xf32>
      %41 = vector.shape_cast %40 : vector<2x8xf32> to vector<2x8x1xf32>
      %42 = vector.broadcast %41 : vector<2x8x1xf32> to vector<2x8x8xf32>
      %43 = arith.subf %39, %42 : vector<2x8x8xf32>
      %44 = math.exp %43 : vector<2x8x8xf32>
      %cst_42 = arith.constant dense<0.000000e+00> : vector<2x8xf32>
      %45 = vector.multi_reduction <add>, %44, %cst_42 [2] : vector<2x8x8xf32> to vector<2x8xf32>
      %46 = vector.shape_cast %45 : vector<2x8xf32> to vector<2x8x1xf32>
      %47 = math.log %46 : vector<2x8x1xf32>
      %48 = arith.addf %41, %47 : vector<2x8x1xf32>
      %49 = vector.broadcast %48 : vector<2x8x1xf32> to vector<2x8x8xf32>
      %50 = arith.subf %39, %49 : vector<2x8x8xf32>
      %cst_43 = arith.constant dense<0xFF800000> : vector<2x8xf32>
      %51 = vector.multi_reduction <maximumf>, %50, %cst_43 [1] : vector<2x8x8xf32> to vector<2x8xf32>
      %52 = vector.shape_cast %51 : vector<2x8xf32> to vector<2x1x8xf32>
      %53 = vector.broadcast %52 : vector<2x1x8xf32> to vector<2x8x8xf32>
      %54 = arith.subf %50, %53 : vector<2x8x8xf32>
      %55 = math.exp %54 : vector<2x8x8xf32>
      %cst_44 = arith.constant dense<0.000000e+00> : vector<2x8xf32>
      %56 = vector.multi_reduction <add>, %55, %cst_44 [1] : vector<2x8x8xf32> to vector<2x8xf32>
      %57 = vector.shape_cast %56 : vector<2x8xf32> to vector<2x1x8xf32>
      %58 = math.log %57 : vector<2x1x8xf32>
      %59 = arith.addf %52, %58 : vector<2x1x8xf32>
      %60 = vector.broadcast %59 : vector<2x1x8xf32> to vector<2x8x8xf32>
      %61 = arith.subf %50, %60 : vector<2x8x8xf32>
      %cst_45 = arith.constant dense<0xFF800000> : vector<2x8xf32>
      %62 = vector.multi_reduction <maximumf>, %61, %cst_45 [2] : vector<2x8x8xf32> to vector<2x8xf32>
      %63 = vector.shape_cast %62 : vector<2x8xf32> to vector<2x8x1xf32>
      %64 = vector.broadcast %63 : vector<2x8x1xf32> to vector<2x8x8xf32>
      %65 = arith.subf %61, %64 : vector<2x8x8xf32>
      %66 = math.exp %65 : vector<2x8x8xf32>
      %cst_46 = arith.constant dense<0.000000e+00> : vector<2x8xf32>
      %67 = vector.multi_reduction <add>, %66, %cst_46 [2] : vector<2x8x8xf32> to vector<2x8xf32>
      %68 = vector.shape_cast %67 : vector<2x8xf32> to vector<2x8x1xf32>
      %69 = math.log %68 : vector<2x8x1xf32>
      %70 = arith.addf %63, %69 : vector<2x8x1xf32>
      %71 = vector.broadcast %70 : vector<2x8x1xf32> to vector<2x8x8xf32>
      %72 = arith.subf %61, %71 : vector<2x8x8xf32>
      %cst_47 = arith.constant dense<0xFF800000> : vector<2x8xf32>
      %73 = vector.multi_reduction <maximumf>, %72, %cst_47 [1] : vector<2x8x8xf32> to vector<2x8xf32>
      %74 = vector.shape_cast %73 : vector<2x8xf32> to vector<2x1x8xf32>
      %75 = vector.broadcast %74 : vector<2x1x8xf32> to vector<2x8x8xf32>
      %76 = arith.subf %72, %75 : vector<2x8x8xf32>
      %77 = math.exp %76 : vector<2x8x8xf32>
      %cst_48 = arith.constant dense<0.000000e+00> : vector<2x8xf32>
      %78 = vector.multi_reduction <add>, %77, %cst_48 [1] : vector<2x8x8xf32> to vector<2x8xf32>
      %79 = vector.shape_cast %78 : vector<2x8xf32> to vector<2x1x8xf32>
      %80 = math.log %79 : vector<2x1x8xf32>
      %81 = arith.addf %74, %80 : vector<2x1x8xf32>
      %82 = vector.broadcast %81 : vector<2x1x8xf32> to vector<2x8x8xf32>
      %83 = arith.subf %72, %82 : vector<2x8x8xf32>
      %cst_49 = arith.constant dense<0xFF800000> : vector<2x8xf32>
      %84 = vector.multi_reduction <maximumf>, %83, %cst_49 [2] : vector<2x8x8xf32> to vector<2x8xf32>
      %85 = vector.shape_cast %84 : vector<2x8xf32> to vector<2x8x1xf32>
      %86 = vector.broadcast %85 : vector<2x8x1xf32> to vector<2x8x8xf32>
      %87 = arith.subf %83, %86 : vector<2x8x8xf32>
      %88 = math.exp %87 : vector<2x8x8xf32>
      %cst_50 = arith.constant dense<0.000000e+00> : vector<2x8xf32>
      %89 = vector.multi_reduction <add>, %88, %cst_50 [2] : vector<2x8x8xf32> to vector<2x8xf32>
      %90 = vector.shape_cast %89 : vector<2x8xf32> to vector<2x8x1xf32>
      %91 = math.log %90 : vector<2x8x1xf32>
      %92 = arith.addf %85, %91 : vector<2x8x1xf32>
      %93 = vector.broadcast %92 : vector<2x8x1xf32> to vector<2x8x8xf32>
      %94 = arith.subf %83, %93 : vector<2x8x8xf32>
      %cst_51 = arith.constant dense<0xFF800000> : vector<2x8xf32>
      %95 = vector.multi_reduction <maximumf>, %94, %cst_51 [1] : vector<2x8x8xf32> to vector<2x8xf32>
      %96 = vector.shape_cast %95 : vector<2x8xf32> to vector<2x1x8xf32>
      %97 = vector.broadcast %96 : vector<2x1x8xf32> to vector<2x8x8xf32>
      %98 = arith.subf %94, %97 : vector<2x8x8xf32>
      %99 = math.exp %98 : vector<2x8x8xf32>
      %cst_52 = arith.constant dense<0.000000e+00> : vector<2x8xf32>
      %100 = vector.multi_reduction <add>, %99, %cst_52 [1] : vector<2x8x8xf32> to vector<2x8xf32>
      %101 = vector.shape_cast %100 : vector<2x8xf32> to vector<2x1x8xf32>
      %102 = math.log %101 : vector<2x1x8xf32>
      %103 = arith.addf %96, %102 : vector<2x1x8xf32>
      %104 = vector.broadcast %103 : vector<2x1x8xf32> to vector<2x8x8xf32>
      %105 = arith.subf %94, %104 : vector<2x8x8xf32>
      %cst_53 = arith.constant dense<0xFF800000> : vector<2x8xf32>
      %106 = vector.multi_reduction <maximumf>, %105, %cst_53 [2] : vector<2x8x8xf32> to vector<2x8xf32>
      %107 = vector.shape_cast %106 : vector<2x8xf32> to vector<2x8x1xf32>
      %108 = vector.broadcast %107 : vector<2x8x1xf32> to vector<2x8x8xf32>
      %109 = arith.subf %105, %108 : vector<2x8x8xf32>
      %110 = math.exp %109 : vector<2x8x8xf32>
      %cst_54 = arith.constant dense<0.000000e+00> : vector<2x8xf32>
      %111 = vector.multi_reduction <add>, %110, %cst_54 [2] : vector<2x8x8xf32> to vector<2x8xf32>
      %112 = vector.shape_cast %111 : vector<2x8xf32> to vector<2x8x1xf32>
      %113 = math.log %112 : vector<2x8x1xf32>
      %114 = arith.addf %107, %113 : vector<2x8x1xf32>
      %115 = vector.broadcast %114 : vector<2x8x1xf32> to vector<2x8x8xf32>
      %116 = arith.subf %105, %115 : vector<2x8x8xf32>
      %cst_55 = arith.constant dense<0xFF800000> : vector<2x8xf32>
      %117 = vector.multi_reduction <maximumf>, %116, %cst_55 [1] : vector<2x8x8xf32> to vector<2x8xf32>
      %118 = vector.shape_cast %117 : vector<2x8xf32> to vector<2x1x8xf32>
      %119 = vector.broadcast %118 : vector<2x1x8xf32> to vector<2x8x8xf32>
      %120 = arith.subf %116, %119 : vector<2x8x8xf32>
      %121 = math.exp %120 : vector<2x8x8xf32>
      %cst_56 = arith.constant dense<0.000000e+00> : vector<2x8xf32>
      %122 = vector.multi_reduction <add>, %121, %cst_56 [1] : vector<2x8x8xf32> to vector<2x8xf32>
      %123 = vector.shape_cast %122 : vector<2x8xf32> to vector<2x1x8xf32>
      %124 = math.log %123 : vector<2x1x8xf32>
      %125 = arith.addf %118, %124 : vector<2x1x8xf32>
      %126 = vector.broadcast %125 : vector<2x1x8xf32> to vector<2x8x8xf32>
      %127 = arith.subf %116, %126 : vector<2x8x8xf32>
      %cst_57 = arith.constant dense<0xFF800000> : vector<2x8xf32>
      %128 = vector.multi_reduction <maximumf>, %127, %cst_57 [2] : vector<2x8x8xf32> to vector<2x8xf32>
      %129 = vector.shape_cast %128 : vector<2x8xf32> to vector<2x8x1xf32>
      %130 = vector.broadcast %129 : vector<2x8x1xf32> to vector<2x8x8xf32>
      %131 = arith.subf %127, %130 : vector<2x8x8xf32>
      %132 = math.exp %131 : vector<2x8x8xf32>
      %cst_58 = arith.constant dense<0.000000e+00> : vector<2x8xf32>
      %133 = vector.multi_reduction <add>, %132, %cst_58 [2] : vector<2x8x8xf32> to vector<2x8xf32>
      %134 = vector.shape_cast %133 : vector<2x8xf32> to vector<2x8x1xf32>
      %135 = math.log %134 : vector<2x8x1xf32>
      %136 = arith.addf %129, %135 : vector<2x8x1xf32>
      %137 = vector.broadcast %136 : vector<2x8x1xf32> to vector<2x8x8xf32>
      %138 = arith.subf %127, %137 : vector<2x8x8xf32>
      %cst_59 = arith.constant dense<0xFF800000> : vector<2x8xf32>
      %139 = vector.multi_reduction <maximumf>, %138, %cst_59 [1] : vector<2x8x8xf32> to vector<2x8xf32>
      %140 = vector.shape_cast %139 : vector<2x8xf32> to vector<2x1x8xf32>
      %141 = vector.broadcast %140 : vector<2x1x8xf32> to vector<2x8x8xf32>
      %142 = arith.subf %138, %141 : vector<2x8x8xf32>
      %143 = math.exp %142 : vector<2x8x8xf32>
      %cst_60 = arith.constant dense<0.000000e+00> : vector<2x8xf32>
      %144 = vector.multi_reduction <add>, %143, %cst_60 [1] : vector<2x8x8xf32> to vector<2x8xf32>
      %145 = vector.shape_cast %144 : vector<2x8xf32> to vector<2x1x8xf32>
      %146 = math.log %145 : vector<2x1x8xf32>
      %147 = arith.addf %140, %146 : vector<2x1x8xf32>
      %148 = vector.broadcast %147 : vector<2x1x8xf32> to vector<2x8x8xf32>
      %149 = arith.subf %138, %148 : vector<2x8x8xf32>
      %cst_61 = arith.constant dense<0xFF800000> : vector<2x8xf32>
      %150 = vector.multi_reduction <maximumf>, %149, %cst_61 [2] : vector<2x8x8xf32> to vector<2x8xf32>
      %151 = vector.shape_cast %150 : vector<2x8xf32> to vector<2x8x1xf32>
      %152 = vector.broadcast %151 : vector<2x8x1xf32> to vector<2x8x8xf32>
      %153 = arith.subf %149, %152 : vector<2x8x8xf32>
      %154 = math.exp %153 : vector<2x8x8xf32>
      %cst_62 = arith.constant dense<0.000000e+00> : vector<2x8xf32>
      %155 = vector.multi_reduction <add>, %154, %cst_62 [2] : vector<2x8x8xf32> to vector<2x8xf32>
      %156 = vector.shape_cast %155 : vector<2x8xf32> to vector<2x8x1xf32>
      %157 = math.log %156 : vector<2x8x1xf32>
      %158 = arith.addf %151, %157 : vector<2x8x1xf32>
      %159 = vector.broadcast %158 : vector<2x8x1xf32> to vector<2x8x8xf32>
      %160 = arith.subf %149, %159 : vector<2x8x8xf32>
      %cst_63 = arith.constant dense<0xFF800000> : vector<2x8xf32>
      %161 = vector.multi_reduction <maximumf>, %160, %cst_63 [1] : vector<2x8x8xf32> to vector<2x8xf32>
      %162 = vector.shape_cast %161 : vector<2x8xf32> to vector<2x1x8xf32>
      %163 = vector.broadcast %162 : vector<2x1x8xf32> to vector<2x8x8xf32>
      %164 = arith.subf %160, %163 : vector<2x8x8xf32>
      %165 = math.exp %164 : vector<2x8x8xf32>
      %cst_64 = arith.constant dense<0.000000e+00> : vector<2x8xf32>
      %166 = vector.multi_reduction <add>, %165, %cst_64 [1] : vector<2x8x8xf32> to vector<2x8xf32>
      %167 = vector.shape_cast %166 : vector<2x8xf32> to vector<2x1x8xf32>
      %168 = math.log %167 : vector<2x1x8xf32>
      %169 = arith.addf %162, %168 : vector<2x1x8xf32>
      %170 = vector.broadcast %169 : vector<2x1x8xf32> to vector<2x8x8xf32>
      %171 = arith.subf %160, %170 : vector<2x8x8xf32>
      %cst_65 = arith.constant dense<0xFF800000> : vector<2x8xf32>
      %172 = vector.multi_reduction <maximumf>, %171, %cst_65 [2] : vector<2x8x8xf32> to vector<2x8xf32>
      %173 = vector.shape_cast %172 : vector<2x8xf32> to vector<2x8x1xf32>
      %174 = vector.broadcast %173 : vector<2x8x1xf32> to vector<2x8x8xf32>
      %175 = arith.subf %171, %174 : vector<2x8x8xf32>
      %176 = math.exp %175 : vector<2x8x8xf32>
      %cst_66 = arith.constant dense<0.000000e+00> : vector<2x8xf32>
      %177 = vector.multi_reduction <add>, %176, %cst_66 [2] : vector<2x8x8xf32> to vector<2x8xf32>
      %178 = vector.shape_cast %177 : vector<2x8xf32> to vector<2x8x1xf32>
      %179 = math.log %178 : vector<2x8x1xf32>
      %180 = arith.addf %173, %179 : vector<2x8x1xf32>
      %181 = vector.broadcast %180 : vector<2x8x1xf32> to vector<2x8x8xf32>
      %182 = arith.subf %171, %181 : vector<2x8x8xf32>
      %cst_67 = arith.constant dense<0xFF800000> : vector<2x8xf32>
      %183 = vector.multi_reduction <maximumf>, %182, %cst_67 [1] : vector<2x8x8xf32> to vector<2x8xf32>
      %184 = vector.shape_cast %183 : vector<2x8xf32> to vector<2x1x8xf32>
      %185 = vector.broadcast %184 : vector<2x1x8xf32> to vector<2x8x8xf32>
      %186 = arith.subf %182, %185 : vector<2x8x8xf32>
      %187 = math.exp %186 : vector<2x8x8xf32>
      %cst_68 = arith.constant dense<0.000000e+00> : vector<2x8xf32>
      %188 = vector.multi_reduction <add>, %187, %cst_68 [1] : vector<2x8x8xf32> to vector<2x8xf32>
      %189 = vector.shape_cast %188 : vector<2x8xf32> to vector<2x1x8xf32>
      %190 = math.log %189 : vector<2x1x8xf32>
      %191 = arith.addf %184, %190 : vector<2x1x8xf32>
      %192 = vector.broadcast %191 : vector<2x1x8xf32> to vector<2x8x8xf32>
      %193 = arith.subf %182, %192 : vector<2x8x8xf32>
      %cst_69 = arith.constant dense<0xFF800000> : vector<2x8xf32>
      %194 = vector.multi_reduction <maximumf>, %193, %cst_69 [2] : vector<2x8x8xf32> to vector<2x8xf32>
      %195 = vector.shape_cast %194 : vector<2x8xf32> to vector<2x8x1xf32>
      %196 = vector.broadcast %195 : vector<2x8x1xf32> to vector<2x8x8xf32>
      %197 = arith.subf %193, %196 : vector<2x8x8xf32>
      %198 = math.exp %197 : vector<2x8x8xf32>
      %cst_70 = arith.constant dense<0.000000e+00> : vector<2x8xf32>
      %199 = vector.multi_reduction <add>, %198, %cst_70 [2] : vector<2x8x8xf32> to vector<2x8xf32>
      %200 = vector.shape_cast %199 : vector<2x8xf32> to vector<2x8x1xf32>
      %201 = math.log %200 : vector<2x8x1xf32>
      %202 = arith.addf %195, %201 : vector<2x8x1xf32>
      %203 = vector.broadcast %202 : vector<2x8x1xf32> to vector<2x8x8xf32>
      %204 = arith.subf %193, %203 : vector<2x8x8xf32>
      %cst_71 = arith.constant dense<0xFF800000> : vector<2x8xf32>
      %205 = vector.multi_reduction <maximumf>, %204, %cst_71 [1] : vector<2x8x8xf32> to vector<2x8xf32>
      %206 = vector.shape_cast %205 : vector<2x8xf32> to vector<2x1x8xf32>
      %207 = vector.broadcast %206 : vector<2x1x8xf32> to vector<2x8x8xf32>
      %208 = arith.subf %204, %207 : vector<2x8x8xf32>
      %209 = math.exp %208 : vector<2x8x8xf32>
      %cst_72 = arith.constant dense<0.000000e+00> : vector<2x8xf32>
      %210 = vector.multi_reduction <add>, %209, %cst_72 [1] : vector<2x8x8xf32> to vector<2x8xf32>
      %211 = vector.shape_cast %210 : vector<2x8xf32> to vector<2x1x8xf32>
      %212 = math.log %211 : vector<2x1x8xf32>
      %213 = arith.addf %206, %212 : vector<2x1x8xf32>
      %214 = vector.broadcast %213 : vector<2x1x8xf32> to vector<2x8x8xf32>
      %215 = arith.subf %204, %214 : vector<2x8x8xf32>
      %216 = math.exp %215 : vector<2x8x8xf32>
      %c0_73 = arith.constant 0 : index
      %c0_74 = arith.constant 0 : index
      %c0_75 = arith.constant 0 : index
      %217 = vector.load %arg5[%c0_73, %c0_74, %c0_75] : memref<2x8x8xf32, #tpu.memory_space<vmem>>, vector<2x8x8xf32>
      tpu.vector_store %arg5[%c0_73, %c0_74, %c0_75], %216 {strides = array<i32>} : memref<2x8x8xf32, #tpu.memory_space<vmem>>, vector<2x8x8xf32>,
    } else {
    }
    return
  }
  func.func @transform_0(%arg0: i32, %arg1: i32) -> (i32, i32, i32, i32) {
    %c0_i32 = arith.constant 0 : i32
    %c0_i32_0 = arith.constant 0 : i32
    %c0_i32_1 = arith.constant 0 : i32
    return %arg0, %arg1, %c0_i32, %c0_i32_0 : i32, i32, i32, i32
  }
  func.func @transform_1(%arg0: i32, %arg1: i32) -> (i32, i32, i32, i32) {
    %c0_i32 = arith.constant 0 : i32
    %c0_i32_0 = arith.constant 0 : i32
    %c0_i32_1 = arith.constant 0 : i32
    return %arg0, %arg1, %c0_i32, %c0_i32_0 : i32, i32, i32, i32
  }
  func.func @transform_2(%arg0: i32, %arg1: i32) -> (i32, i32, i32) {
    %c0_i32 = arith.constant 0 : i32
    %c0_i32_0 = arith.constant 0 : i32
    %c0_i32_1 = arith.constant 0 : i32
    return %arg0, %c0_i32, %c0_i32_0 : i32, i32, i32
  }
  func.func @transform_3(%arg0: i32, %arg1: i32) -> (i32, i32, i32) {
    %c0_i32 = arith.constant 0 : i32
    %c0_i32_0 = arith.constant 0 : i32
    %c0_i32_1 = arith.constant 0 : i32
    return %arg0, %c0_i32, %c0_i32_0 : i32, i32, i32
  }
}

</mosaic_0001>

<bundles_post_ra>
// kernel: tpu_custom_call.1
= control target key start
LH: loop header
LB: loop body
LE: loop exit
PB: predicated region body
PF: predicated region fallthrough
CT: control target
= control target key end

     0   :  { %8 = vsyncpa [#allocation5], 0  ;;  %s1348_s0 = inlined_call_operand.hbm [shape: f32[2,8,8,32], index: 0, kind: input, shape index: {}]   ;;  %s1349_s1 = inlined_call_operand.hbm [shape: f32[2,8,8,32], index: 1, kind: input, shape index: {}]   ;;  %s1350_s2 = inlined_call_operand.hbm [shape: f32[2,8,8], index: 2, kind: input, shape index: {}]   ;;  %s1351_s3 = inlined_call_operand.hbm [shape: f32[2,8,8], index: 3, kind: output, shape index: {}]  }
   0x1   :  { %9 = vsyncpa [#allocation8], 0 }
   0x2   :  { %10 = vsyncpa [#allocation6], 0  ;;  %s1186_s12 = smov [#allocation7]   ;;  %s1187_s14 = smov [#allocation4]  }
   0x3   :  { %s28_s13 = sshll.u32 %s1186_s12, 4  ;;  %s16_s15 = sshll.u32 %s1187_s14, 4  ;;  %s29_s13 = int_to_ptr.vmem [resolvable:$true] %s28_s13  ;;  %s17_s15 = int_to_ptr.vmem [resolvable:$true] %s16_s15 }
   0x4   :  { %s1108_s16 = scalar_lea.vmem %s29_s13, 2048  ;;  %p1113_p1 = scmp.lt.s32.totalorder %s29_s13, %s29_s13 }
   0x5   :  { %p1109_p0 = scmp.ne.s32.totalorder %s29_s13, %s1108_s16  ;;  %p1114_p2 = scmp.lt.s32.totalorder %s1108_s16, %s1108_s16 }
   0x7   :  { %p1115_p3 = por %p1114_p2, %p1113_p1 }
   0x9   :  { %p1116_p4 = pnand %p1115_p3, %p1109_p0 }
   0xb   :  { %1119 = shalt.err (!%p1116_p4)
}
   0xc   :  { %s1188_s17 = smov 128   ;;  %s1189_s18 = smov 8  }
   0xd   :  { %34 = dma.hbm_to_vmem [thread:$0]  %s1349_s1, 2048, %s29_s13, [#allocation8], %s1188_s17, %s1188_s17, %s1189_s18  }
   0xe   :  { %s1128_s21 = scalar_lea.vmem %s17_s15, 2048  ;;  %p1133_p6 = scmp.lt.s32.totalorder %s17_s15, %s17_s15 }
   0xf   :  { %p1129_p5 = scmp.ne.s32.totalorder %s17_s15, %s1128_s21  ;;  %p1134_p7 = scmp.lt.s32.totalorder %s1128_s21, %s1128_s21 }
  0x11   :  { %p1135_p8 = por %p1134_p7, %p1133_p6 }
  0x13   :  { %p1136_p9 = pnand %p1135_p8, %p1129_p5 }
  0x15   :  { %1139 = shalt.err (!%p1136_p9)
}
  0x16   :  { %22 = dma.hbm_to_vmem [thread:$0]  %s1348_s0, 2048, %s17_s15, [#allocation5], %s1188_s17, %s1188_s17, %s1189_s18  }
  0x17   :  { %s1190_s24 = smov [#allocation9]  }
  0x18   :  { %s40_s25 = sshll.u32 %s1190_s24, 4  ;;  %s41_s25 = int_to_ptr.vmem [resolvable:$true] %s40_s25 }
  0x19   :  { %s1148_s26 = scalar_lea.vmem %s41_s25, 256  ;;  %p1153_p11 = scmp.lt.s32.totalorder %s41_s25, %s41_s25 }
  0x1a   :  { %p1149_p10 = scmp.ne.s32.totalorder %s41_s25, %s1148_s26  ;;  %p1154_p12 = scmp.lt.s32.totalorder %s1148_s26, %s1148_s26 }
  0x1c   :  { %p1155_p13 = por %p1154_p12, %p1153_p11 }
  0x1e   :  { %p1156_p0 = pnand %p1155_p13, %p1149_p10 }
  0x20   :  { %1159 = shalt.err (!%p1156_p0)
}
  0x21   :  { %46 = dma.hbm_to_vmem [thread:$0]  %s1350_s2, 256, %s41_s25, [#allocation8], %s1188_s17, %s1188_s17, %s1189_s18  }
  0x22   :  { %1180 = dma.done.wait [#allocation5], 2048  }
  0x23   :  { %1181 = vsyncadd [#allocation5], 4294965248 }
  0x24   :  { %1182 = dma.done.wait [#allocation8], 2304  }
  0x25   :  { %1183 = vsyncadd [#allocation8], 4294964992  ;;  %vm60_vm0 = vcmask 261120   ;;  %v1191_v0 = vmov 0.0   ;;  %vm1192_vm1 = vmmov 0   ;;  %v120_v1 = vld [vmem:[#allocation7] sm:$0xff] }
  0x26   :  { %61 = vst.msk [vmem:[#allocation2] sm:$0xff] %vm60_vm0, %v1191_v0  ;;  %62 = vst.msk [vmem:[#allocation2 + $0x8] sm:$0xff] %vm60_vm0, %v1191_v0  ;;  %938 = vmatprep.subr.mxu0 %v1191_v0  ;;  %943 = vmatprep.subr.mxu1 %v1191_v0  ;;  %v121_v2 = vld [vmem:[#allocation7 + $0x8] sm:$0xff]  ;;  %v122_v3 = vld [vmem:[#allocation7 + $0x10] sm:$0xff]  ;;  %v136_v5 = vsel %vm60_vm0, %v120_v1, 0.0  ;;  %vm361_vm2 = vcmask 64512  }
  0x27   :  { %63 = vst.msk [vmem:[#allocation3] sm:$0xff] %vm60_vm0, %v1191_v0  ;;  %64 = vst.msk [vmem:[#allocation3 + $0x8] sm:$0xff] %vm60_vm0, %v1191_v0  ;;  %940 = vmatprep.mubr.msk.f32.mxu0 %vm1192_vm1, %v1191_v0  ;;  %945 = vmatprep.mubr.msk.f32.mxu1 %vm1192_vm1, %v1191_v0  ;;  %v123_v4 = vld [vmem:[#allocation7 + $0x18] sm:$0xff]  ;;  %v137_v6 = vsel %vm60_vm0, %v121_v2, 0.0  ;;  %v139_v7 = vsel %vm60_vm0, %v122_v3, 0.0  ;;  %v124_v8 = vld [vmem:[#allocation7 + $0x20] sm:$0xff] }
  0x28   :  { %v138_v9 = vadd.f32 %v137_v6, %v136_v5  ;;  %v141_v10 = vsel %vm60_vm0, %v123_v4, 0.0  ;;  %v128_v11 = vld [vmem:[#allocation7 + $0x40] sm:$0xff]  ;;  %v129_v12 = vld [vmem:[#allocation7 + $0x48] sm:$0xff]  ;;  %v130_v15 = vld [vmem:[#allocation7 + $0x50] sm:$0xff]  ;;  %v143_v20 = vsel %vm60_vm0, %v124_v8, 0.0  ;;  %s1193_s0 = smov [#allocation10]  }
  0x29   :  { %v125_v13 = vld [vmem:[#allocation7 + $0x28] sm:$0xff]  ;;  %v131_v16 = vld [vmem:[#allocation7 + $0x58] sm:$0xff]  ;;  %v151_v17 = vsel %vm60_vm0, %v128_v11, 0.0  ;;  %v152_v18 = vsel %vm60_vm0, %v129_v12, 0.0  ;;  %v126_v19 = vld [vmem:[#allocation7 + $0x30] sm:$0xff]  ;;  %v154_v23 = vsel %vm60_vm0, %v130_v15, 0.0 }
  0x2a   :  { %v140_v14 = vadd.f32 %v139_v7, %v138_v9  ;;  %v132_v21 = vld [vmem:[#allocation7 + $0x60] sm:$0xff]  ;;  %v153_v22 = vadd.f32 %v152_v18, %v151_v17  ;;  %v127_v24 = vld [vmem:[#allocation7 + $0x38] sm:$0xff]  ;;  %v156_v26 = vsel %vm60_vm0, %v131_v16, 0.0  ;;  %v68_v28 = vld [vmem:[#allocation4 + $0x8] sm:$0xff]  ;;  %v145_v29 = vsel %vm60_vm0, %v125_v13, 0.0  ;;  %s917_s2 = sshll.u32 %s1193_s0, 4  ;;  %s918_s2 = int_to_ptr.vmem [resolvable:$true] %s917_s2 }
  0x2b   :  { %v67_v27 = vld [vmem:[#allocation4] sm:$0xff]  ;;  %v133_v30 = vld [vmem:[#allocation7 + $0x68] sm:$0xff]  ;;  %v69_v32 = vld [vmem:[#allocation4 + $0x10] sm:$0xff]  ;;  %v85_v35 = vsel %vm60_vm0, %v68_v28, 0.0  ;;  %v158_v37 = vsel %vm60_vm0, %v132_v21, 0.0  ;;  %v147_v41 = vsel %vm60_vm0, %v126_v19, 0.0  ;;  %p1165_p2 = scmp.lt.s32.totalorder %s918_s2, %s918_s2 }
  0x2c   :  { %v142_v25 = vadd.f32 %v141_v10, %v140_v14  ;;  %v155_v31 = vadd.f32 %v154_v23, %v153_v22  ;;  %v70_v33 = vld [vmem:[#allocation4 + $0x18] sm:$0xff]  ;;  %v84_v34 = vsel %vm60_vm0, %v67_v27, 0.0  ;;  %v71_v38 = vld [vmem:[#allocation4 + $0x20] sm:$0xff]  ;;  %v87_v40 = vsel %vm60_vm0, %v69_v32, 0.0  ;;  %v134_v43 = vld [vmem:[#allocation7 + $0x70] sm:$0xff]  ;;  %s1160_s28 = scalar_lea.vmem %s918_s2, 256 }
  0x2d   :  { %v86_v39 = vadd.f32 %v85_v35, %v84_v34  ;;  %v149_v42 = vsel %vm60_vm0, %v127_v24, 0.0  ;;  %v89_v45 = vsel %vm60_vm0, %v70_v33, 0.0  ;;  %v75_v46 = vld [vmem:[#allocation4 + $0x40] sm:$0xff]  ;;  %v76_v47 = vld [vmem:[#allocation4 + $0x48] sm:$0xff]  ;;  %v160_v49 = vsel %vm60_vm0, %v133_v30, 0.0  ;;  %v77_v52 = vld [vmem:[#allocation4 + $0x50] sm:$0xff]  ;;  %p1161_p1 = scmp.ne.s32.totalorder %s918_s2, %s1160_s28  ;;  %p1166_p3 = scmp.lt.s32.totalorder %s1160_s28, %s1160_s28 }
  0x2e   :  { %v144_v36 = vadd.f32 %v143_v20, %v142_v25  ;;  %v157_v44 = vadd.f32 %v156_v26, %v155_v31  ;;  %v72_v50 = vld [vmem:[#allocation4 + $0x28] sm:$0xff]  ;;  %v78_v53 = vld [vmem:[#allocation4 + $0x58] sm:$0xff]  ;;  %v99_v54 = vsel %vm60_vm0, %v75_v46, 0.0  ;;  %v91_v57 = vsel %vm60_vm0, %v71_v38, 0.0  ;;  %v73_v62 = vld [vmem:[#allocation4 + $0x30] sm:$0xff] }
  0x2f   :  { %v88_v51 = vadd.f32 %v87_v40, %v86_v39  ;;  %v135_v55 = vld [vmem:[#allocation7 + $0x78] sm:$0xff]  ;;  %v100_v58 = vsel %vm60_vm0, %v76_v47, 0.0  ;;  %v102_v59 = vsel %vm60_vm0, %v77_v52, 0.0  ;;  %v162_v61 = vsel %vm60_vm0, %v134_v43, 0.0  ;;  %v79_v0 = vld [vmem:[#allocation4 + $0x60] sm:$0xff]  ;;  %v118_v2 = vld [vmem:[#allocation3] sm:$0xff]  ;;  %p1167_p4 = por %p1166_p3, %p1165_p2 }
  0x30   :  { %v146_v48 = vadd.f32 %v145_v29, %v144_v36  ;;  %v159_v56 = vadd.f32 %v158_v37, %v157_v44  ;;  %v101_v1 = vadd.f32 %v100_v58, %v99_v54  ;;  %v93_v4 = vsel %vm60_vm0, %v72_v50, 0.0  ;;  %v74_v8 = vld [vmem:[#allocation4 + $0x38] sm:$0xff]  ;;  %v80_v10 = vld [vmem:[#allocation4 + $0x68] sm:$0xff]  ;;  %v81_v18 = vld [vmem:[#allocation4 + $0x70] sm:$0xff] }
  0x31   :  { %v90_v63 = vadd.f32 %v89_v45, %v88_v51  ;;  %v104_v5 = vsel %vm60_vm0, %v78_v53, 0.0  ;;  %v164_v7 = vsel %vm60_vm0, %v135_v55, 0.0  ;;  %v95_v13 = vsel %vm60_vm0, %v73_v62, 0.0  ;;  %v119_v16 = vld [vmem:[#allocation3 + $0x8] sm:$0xff]  ;;  %v65_v27 = vld [vmem:[#allocation2] sm:$0xff]  ;;  %v66_v34 = vld [vmem:[#allocation2 + $0x8] sm:$0xff]  ;;  %p1168_p5 = pnand %p1167_p4, %p1161_p1 }
  0x32   :  { %v148_v60 = vadd.f32 %v147_v41, %v146_v48  ;;  %v161_v3 = vadd.f32 %v160_v49, %v159_v56  ;;  %v103_v11 = vadd.f32 %v102_v59, %v101_v1  ;;  %v106_v14 = vsel %vm60_vm0, %v79_v0, 0.0  ;;  %v82_v24 = vld [vmem:[#allocation4 + $0x78] sm:$0xff]  ;;  %v333_v41 = vld [vmem:[#allocation9] sm:$0xff]  ;;  %v334_v43 = vld [vmem:[#allocation9 + $0x8] sm:$0xff] }
  0x33   :  { %v92_v9 = vadd.f32 %v91_v57, %v90_v63  ;;  %v97_v21 = vsel %vm60_vm0, %v74_v8, 0.0  ;;  %v108_v22 = vsel %vm60_vm0, %v80_v10, 0.0  ;;  %v110_v28 = vsel %vm60_vm0, %v81_v18, 0.0 }
  0x34   :  { %v150_v6 = vadd.f32 %v149_v42, %v148_v60  ;;  %v163_v12 = vadd.f32 %v162_v61, %v161_v3  ;;  %v105_v19 = vadd.f32 %v104_v5, %v103_v11  ;;  %v112_v31 = vsel %vm60_vm0, %v82_v24, 0.0 }
  0x35   :  { %v94_v17 = vadd.f32 %v93_v4, %v92_v9  ;;  %v335_v42 = vadd.f32 1e-06, %v333_v41  ;;  %v336_v44 = vadd.f32 1e-06, %v334_v43 }
  0x36   :  { %v166_v15 = vadd.f32 %v150_v6, %v118_v2  ;;  %v165_v20 = vadd.f32 %v164_v7, %v163_v12  ;;  %v107_v25 = vadd.f32 %v106_v14, %v105_v19 }
  0x37   :  { %v96_v23 = vadd.f32 %v95_v13, %v94_v17  ;;  %956 = vlog2.f32 %v335_v42 }
  0x38   :  { %168 = vst.msk [vmem:[#allocation3] sm:$0xff] %vm60_vm0, %v166_v15  ;;  %v167_v26 = vadd.f32 %v165_v20, %v119_v16  ;;  %v109_v30 = vadd.f32 %v108_v22, %v107_v25  ;;  %958 = vlog2.f32 %v336_v44 }
  0x39   :  { %v98_v29 = vadd.f32 %v97_v21, %v96_v23 }
  0x3a   :  { %169 = vst.msk [vmem:[#allocation3 + $0x8] sm:$0xff] %vm60_vm0, %v167_v26  ;;  %v111_v33 = vadd.f32 %v110_v28, %v109_v30 }
  0x3b   :  { %v114_v32 = vadd.f32 %v98_v29, %v65_v27 }
  0x3c   :  { %v113_v35 = vadd.f32 %v112_v31, %v111_v33 }
  0x3d   :  { %116 = vst.msk [vmem:[#allocation2] sm:$0xff] %vm60_vm0, %v114_v32 }
  0x3e   :  { %v115_v37 = vadd.f32 %v113_v35, %v66_v34 }
  0x3f   :  { %v175_v36 = vld [vmem:[#allocation3] sm:$0xff] }
  0x40   :  { %939 = vmatpush3.xpose.msk.msra.mxu0 %vm60_vm0, %v175_v36  ;;  %117 = vst.msk [vmem:[#allocation2 + $0x8] sm:$0xff] %vm60_vm0, %v115_v37 }
  0x41   :  { %v176_v38 = vld [vmem:[#allocation3 + $0x8] sm:$0xff] }
  0x42   :  { %944 = vmatpush3.xpose.msk.msra.mxu1 %vm60_vm0, %v176_v38 }
  0x44   :  { %v173_v39 = vld [vmem:[#allocation2] sm:$0xff]  ;;  %v957_v45 = vpop.eup %956 }
  0x45   :  { %941 = vmatmul.mubr.msk.f32.vlgmr.msra.gmra.mxu0 %vm60_vm0, %v173_v39  ;;  %v338_v46 = vmul.f32 0.6931472, %v957_v45  ;;  %v959_v47 = vpop.eup %958 }
  0x46   :  { %v340_v49 = vmul.f32 0.6931472, %v959_v47 }
  0x47   :  { %v174_v40 = vld [vmem:[#allocation2 + $0x8] sm:$0xff]  ;;  %v341_v48 = vsub.f32 0.0, %v338_v46 }
  0x48   :  { %946 = vmatmul.mubr.msk.f32.vlgmr.msra.gmra.mxu1 %vm60_vm0, %v174_v40  ;;  %v342_v51 = vsub.f32 0.0, %v340_v49 }
  0x49   :  { %v343_v50 = vadd.f32 1e-06, %v341_v48 }
  0x4a   :  { %v344_v52 = vadd.f32 1e-06, %v342_v51 }
  0x4b   :  { %960 = vlog2.f32 %v343_v50 }
  0x4c   :  { %962 = vlog2.f32 %v344_v52 }
  0x58   :  { %v961_v63 = vpop.eup %960 }
  0x59   :  { %v346_v0 = vmul.f32 0.6931472, %v961_v63  ;;  %v963_v1 = vpop.eup %962 }
  0x5a   :  { %v348_v3 = vmul.f32 0.6931472, %v963_v1 }
  0x5b   :  { %v349_v2 = vsub.f32 0.0, %v346_v0 }
  0x5c   :  { %v350_v7 = vsub.f32 0.0, %v348_v3 }
 0x105   :  { %v249_v53 = vpop.f32.mrf.mxu0 }
 0x106   :  { %v329_v54 = vmul.f32 0.0055242716, %v249_v53 }
 0x107   :  { %v942_v55 = vpop.f32.mrf.mxu0 }
 0x108   :  { %v331_v56 = vmax.f32 %v329_v54, 0.0  ;;  %v325_v57 = vpop.f32.mrf.mxu1 }
 0x109   :  { %v330_v59 = vmul.f32 0.0055242716, %v325_v57 }
 0x10a   :  { %v351_v58 = vmax.f32 %v331_v56, 1e-30  ;;  %v947_v60 = vpop.f32.mrf.mxu1 }
 0x10b   :  { %v332_v61 = vmax.f32 %v330_v59, 0.0 }
 0x10c   :  { %964 = vlog2.f32 %v351_v58 }
 0x10d   :  { %v352_v62 = vmax.f32 %v332_v61, 1e-30 }
 0x10f   :  { %966 = vlog2.f32 %v352_v62 }
 0x119   :  { %v965_v4 = vpop.eup %964 }
 0x11a   :  { %v354_v5 = vmul.f32 0.6931472, %v965_v4 }
 0x11c   :  { %v357_v6 = vadd.f32 %v354_v5, %v349_v2  ;;  %v967_v8 = vpop.eup %966 }
 0x11d   :  { %v356_v9 = vmul.f32 0.6931472, %v967_v8 }
 0x11e   :  { %v359_v10 = vmul.f32 1.4285715, %v357_v6 }
 0x11f   :  { %v358_v12 = vadd.f32 %v356_v9, %v350_v7 }
 0x120   :  { %v362_v11 = vsel %vm361_vm2, %v359_v10, -inf }
 0x121   :  { %363 = vmax.xlane.f32.xlu0 %v362_v11  ;;  %v360_v13 = vmul.f32 1.4285715, %v358_v12 }
 0x123   :  { %v365_v14 = vsel %vm361_vm2, %v360_v13, -inf }
 0x125   :  { %366 = vmax.xlane.f32.xlu0 %v365_v14 }
 0x1aa   :  { %v364_v15 = vpop.xlane.xlu0 %363 }
 0x1ab   :  { %v368_v16 = vsub.f32 %v359_v10, %v364_v15 }
 0x1ad   :  { %v370_v17 = vmul.f32 1.442695, %v368_v16 }
 0x1ae   :  { %v367_v18 = vpop.xlane.xlu0 %366 }
 0x1af   :  { %968 = vpow2.f32 %v370_v17  ;;  %v369_v19 = vsub.f32 %v360_v13, %v367_v18 }
 0x1b1   :  { %v372_v20 = vmul.f32 1.442695, %v369_v19 }
 0x1b3   :  { %970 = vpow2.f32 %v372_v20 }
 0x1bc   :  { %v969_v21 = vpop.eup %968 }
 0x1bd   :  { %v374_v22 = vsel %vm361_vm2, %v969_v21, 0.0 }
 0x1be   :  { %375 = vadd.xlane.f32.xlu1 %v374_v22 }
 0x1c0   :  { %v971_v23 = vpop.eup %970 }
 0x1c1   :  { %v377_v24 = vsel %vm361_vm2, %v971_v23, 0.0 }
 0x1c2   :  { %378 = vadd.xlane.f32.xlu1 %v377_v24 }
 0x247   :  { %v376_v25 = vpop.xlane.xlu1 %375 }
 0x248   :  { %972 = vlog2.f32 %v376_v25 }
 0x24b   :  { %v379_v26 = vpop.xlane.xlu1 %378 }
 0x24c   :  { %974 = vlog2.f32 %v379_v26 }
 0x255   :  { %v973_v27 = vpop.eup %972 }
 0x256   :  { %v381_v28 = vmul.f32 0.6931472, %v973_v27 }
 0x258   :  { %v384_v29 = vadd.f32 %v381_v28, %v364_v15 }
 0x259   :  { %v975_v30 = vpop.eup %974 }
 0x25a   :  { %v386_v31 = vsub.f32 %v359_v10, %v384_v29  ;;  %v383_v32 = vmul.f32 0.6931472, %v975_v30 }
 0x25c   :  { %v388_v33 = vsel %vm361_vm2, %v386_v31, -inf  ;;  %v385_v34 = vadd.f32 %v383_v32, %v367_v18 }
 0x25d   :  { %v389_v35 = vrot.slane %v388_v33, 4 }
 0x25e   :  { %v387_v36 = vsub.f32 %v360_v13, %v385_v34 }
 0x25f   :  { %v390_v37 = vmax.f32 %v388_v33, %v389_v35 }
 0x260   :  { %v395_v38 = vsel %vm361_vm2, %v387_v36, -inf }
 0x261   :  { %v396_v39 = vrot.slane %v395_v38, 4  ;;  %v391_v40 = vrot.slane %v390_v37, 2 }
 0x263   :  { %v392_v41 = vmax.f32 %v390_v37, %v391_v40  ;;  %v397_v42 = vmax.f32 %v395_v38, %v396_v39 }
 0x265   :  { %v393_v43 = vrot.slane %v392_v41, 1  ;;  %v398_v44 = vrot.slane %v397_v42, 2 }
 0x267   :  { %v394_v45 = vmax.f32 %v392_v41, %v393_v43  ;;  %v399_v46 = vmax.f32 %v397_v42, %v398_v44 }
 0x269   :  { %v402_v47 = vsub.f32 %v386_v31, %v394_v45  ;;  %v400_v48 = vrot.slane %v399_v46, 1 }
 0x26b   :  { %v404_v49 = vmul.f32 1.442695, %v402_v47  ;;  %v401_v50 = vmax.f32 %v399_v46, %v400_v48 }
 0x26d   :  { %976 = vpow2.f32 %v404_v49  ;;  %v403_v51 = vsub.f32 %v387_v36, %v401_v50 }
 0x26f   :  { %v406_v52 = vmul.f32 1.442695, %v403_v51 }
 0x271   :  { %978 = vpow2.f32 %v406_v52 }
 0x27a   :  { %v977_v53 = vpop.eup %976 }
 0x27b   :  { %v408_v54 = vsel %vm361_vm2, %v977_v53, 0.0 }
 0x27c   :  { %v409_v55 = vrot.slane %v408_v54, 4 }
 0x27e   :  { %v979_v56 = vpop.eup %978  ;;  %v410_v57 = vadd.f32 %v409_v55, %v408_v54 }
 0x27f   :  { %v415_v58 = vsel %vm361_vm2, %v979_v56, 0.0 }
 0x280   :  { %v411_v59 = vrot.slane %v410_v57, 2  ;;  %v416_v60 = vrot.slane %v415_v58, 4 }
 0x282   :  { %v412_v61 = vadd.f32 %v411_v59, %v410_v57  ;;  %v417_v62 = vadd.f32 %v416_v60, %v415_v58 }
 0x284   :  { %v413_v63 = vrot.slane %v412_v61, 1  ;;  %v418_v0 = vrot.slane %v417_v62, 2 }
 0x286   :  { %v414_v1 = vadd.f32 %v413_v63, %v412_v61  ;;  %v419_v2 = vadd.f32 %v418_v0, %v417_v62 }
 0x288   :  { %980 = vlog2.f32 %v414_v1  ;;  %v420_v3 = vrot.slane %v419_v2, 1 }
 0x28a   :  { %v421_v4 = vadd.f32 %v420_v3, %v419_v2 }
 0x28c   :  { %982 = vlog2.f32 %v421_v4 }
 0x295   :  { %v981_v5 = vpop.eup %980 }
 0x296   :  { %v423_v6 = vmul.f32 0.6931472, %v981_v5 }
 0x298   :  { %v426_v7 = vadd.f32 %v423_v6, %v394_v45 }
 0x299   :  { %v983_v8 = vpop.eup %982 }
 0x29a   :  { %v428_v9 = vsub.f32 %v386_v31, %v426_v7  ;;  %v425_v10 = vmul.f32 0.6931472, %v983_v8 }
 0x29c   :  { %v430_v11 = vsel %vm361_vm2, %v428_v9, -inf  ;;  %v427_v12 = vadd.f32 %v425_v10, %v401_v50 }
 0x29d   :  { %431 = vmax.xlane.f32.xlu0 %v430_v11 }
 0x29e   :  { %v429_v13 = vsub.f32 %v387_v36, %v427_v12 }
 0x2a0   :  { %v433_v14 = vsel %vm361_vm2, %v429_v13, -inf }
 0x2a1   :  { %434 = vmax.xlane.f32.xlu1 %v433_v14 }
 0x326   :  { %v432_v15 = vpop.xlane.xlu0 %431 }
 0x327   :  { %v436_v16 = vsub.f32 %v428_v9, %v432_v15 }
 0x329   :  { %v438_v17 = vmul.f32 1.442695, %v436_v16 }
 0x32a   :  { %v435_v18 = vpop.xlane.xlu1 %434 }
 0x32b   :  { %984 = vpow2.f32 %v438_v17  ;;  %v437_v19 = vsub.f32 %v429_v13, %v435_v18 }
 0x32d   :  { %v440_v20 = vmul.f32 1.442695, %v437_v19 }
 0x32f   :  { %986 = vpow2.f32 %v440_v20 }
 0x338   :  { %v985_v21 = vpop.eup %984 }
 0x339   :  { %v442_v22 = vsel %vm361_vm2, %v985_v21, 0.0 }
 0x33a   :  { %443 = vadd.xlane.f32.xlu0 %v442_v22 }
 0x33c   :  { %v987_v23 = vpop.eup %986 }
 0x33d   :  { %v445_v24 = vsel %vm361_vm2, %v987_v23, 0.0 }
 0x33e   :  { %446 = vadd.xlane.f32.xlu1 %v445_v24 }
 0x3c3   :  { %v444_v25 = vpop.xlane.xlu0 %443 }
 0x3c4   :  { %988 = vlog2.f32 %v444_v25 }
 0x3c7   :  { %v447_v26 = vpop.xlane.xlu1 %446 }
 0x3c8   :  { %990 = vlog2.f32 %v447_v26 }
 0x3d1   :  { %v989_v27 = vpop.eup %988 }
 0x3d2   :  { %v449_v28 = vmul.f32 0.6931472, %v989_v27 }
 0x3d4   :  { %v452_v29 = vadd.f32 %v449_v28, %v432_v15 }
 0x3d5   :  { %v991_v30 = vpop.eup %990 }
 0x3d6   :  { %v454_v31 = vsub.f32 %v428_v9, %v452_v29  ;;  %v451_v32 = vmul.f32 0.6931472, %v991_v30 }
 0x3d8   :  { %v456_v33 = vsel %vm361_vm2, %v454_v31, -inf  ;;  %v453_v34 = vadd.f32 %v451_v32, %v435_v18 }
 0x3d9   :  { %v457_v35 = vrot.slane %v456_v33, 4 }
 0x3da   :  { %v455_v36 = vsub.f32 %v429_v13, %v453_v34 }
 0x3db   :  { %v458_v37 = vmax.f32 %v456_v33, %v457_v35 }
 0x3dc   :  { %v463_v38 = vsel %vm361_vm2, %v455_v36, -inf }
 0x3dd   :  { %v464_v39 = vrot.slane %v463_v38, 4  ;;  %v459_v40 = vrot.slane %v458_v37, 2 }
 0x3df   :  { %v460_v41 = vmax.f32 %v458_v37, %v459_v40  ;;  %v465_v42 = vmax.f32 %v463_v38, %v464_v39 }
 0x3e1   :  { %v461_v43 = vrot.slane %v460_v41, 1  ;;  %v466_v44 = vrot.slane %v465_v42, 2 }
 0x3e3   :  { %v462_v45 = vmax.f32 %v460_v41, %v461_v43  ;;  %v467_v46 = vmax.f32 %v465_v42, %v466_v44 }
 0x3e5   :  { %v470_v47 = vsub.f32 %v454_v31, %v462_v45  ;;  %v468_v48 = vrot.slane %v467_v46, 1 }
 0x3e7   :  { %v472_v49 = vmul.f32 1.442695, %v470_v47  ;;  %v469_v50 = vmax.f32 %v467_v46, %v468_v48 }
 0x3e9   :  { %992 = vpow2.f32 %v472_v49  ;;  %v471_v51 = vsub.f32 %v455_v36, %v469_v50 }
 0x3eb   :  { %v474_v52 = vmul.f32 1.442695, %v471_v51 }
 0x3ed   :  { %994 = vpow2.f32 %v474_v52 }
 0x3f6   :  { %v993_v53 = vpop.eup %992 }
 0x3f7   :  { %v476_v54 = vsel %vm361_vm2, %v993_v53, 0.0 }
 0x3f8   :  { %v477_v55 = vrot.slane %v476_v54, 4 }
 0x3fa   :  { %v995_v56 = vpop.eup %994  ;;  %v478_v57 = vadd.f32 %v477_v55, %v476_v54 }
 0x3fb   :  { %v483_v58 = vsel %vm361_vm2, %v995_v56, 0.0 }
 0x3fc   :  { %v479_v59 = vrot.slane %v478_v57, 2  ;;  %v484_v60 = vrot.slane %v483_v58, 4 }
 0x3fe   :  { %v480_v61 = vadd.f32 %v479_v59, %v478_v57  ;;  %v485_v62 = vadd.f32 %v484_v60, %v483_v58 }
 0x400   :  { %v481_v63 = vrot.slane %v480_v61, 1  ;;  %v486_v0 = vrot.slane %v485_v62, 2 }
 0x402   :  { %v482_v1 = vadd.f32 %v481_v63, %v480_v61  ;;  %v487_v2 = vadd.f32 %v486_v0, %v485_v62 }
 0x404   :  { %996 = vlog2.f32 %v482_v1  ;;  %v488_v3 = vrot.slane %v487_v2, 1 }
 0x406   :  { %v489_v4 = vadd.f32 %v488_v3, %v487_v2 }
 0x408   :  { %998 = vlog2.f32 %v489_v4 }
 0x411   :  { %v997_v5 = vpop.eup %996 }
 0x412   :  { %v491_v6 = vmul.f32 0.6931472, %v997_v5 }
 0x414   :  { %v494_v7 = vadd.f32 %v491_v6, %v462_v45 }
 0x415   :  { %v999_v8 = vpop.eup %998 }
 0x416   :  { %v496_v9 = vsub.f32 %v454_v31, %v494_v7  ;;  %v493_v10 = vmul.f32 0.6931472, %v999_v8 }
 0x418   :  { %v498_v11 = vsel %vm361_vm2, %v496_v9, -inf  ;;  %v495_v12 = vadd.f32 %v493_v10, %v469_v50 }
 0x419   :  { %499 = vmax.xlane.f32.xlu0 %v498_v11 }
 0x41a   :  { %v497_v13 = vsub.f32 %v455_v36, %v495_v12 }
 0x41c   :  { %v501_v14 = vsel %vm361_vm2, %v497_v13, -inf }
 0x41d   :  { %502 = vmax.xlane.f32.xlu1 %v501_v14 }
 0x4a2   :  { %v500_v15 = vpop.xlane.xlu0 %499 }
 0x4a3   :  { %v504_v16 = vsub.f32 %v496_v9, %v500_v15 }
 0x4a5   :  { %v506_v17 = vmul.f32 1.442695, %v504_v16 }
 0x4a6   :  { %v503_v18 = vpop.xlane.xlu1 %502 }
 0x4a7   :  { %1000 = vpow2.f32 %v506_v17  ;;  %v505_v19 = vsub.f32 %v497_v13, %v503_v18 }
 0x4a9   :  { %v508_v20 = vmul.f32 1.442695, %v505_v19 }
 0x4ab   :  { %1002 = vpow2.f32 %v508_v20 }
 0x4b4   :  { %v1001_v21 = vpop.eup %1000 }
 0x4b5   :  { %v510_v22 = vsel %vm361_vm2, %v1001_v21, 0.0 }
 0x4b6   :  { %511 = vadd.xlane.f32.xlu0 %v510_v22 }
 0x4b8   :  { %v1003_v23 = vpop.eup %1002 }
 0x4b9   :  { %v513_v24 = vsel %vm361_vm2, %v1003_v23, 0.0 }
 0x4ba   :  { %514 = vadd.xlane.f32.xlu1 %v513_v24 }
 0x53f   :  { %v512_v25 = vpop.xlane.xlu0 %511 }
 0x540   :  { %1004 = vlog2.f32 %v512_v25 }
 0x543   :  { %v515_v26 = vpop.xlane.xlu1 %514 }
 0x544   :  { %1006 = vlog2.f32 %v515_v26 }
 0x54d   :  { %v1005_v27 = vpop.eup %1004 }
 0x54e   :  { %v517_v28 = vmul.f32 0.6931472, %v1005_v27 }
 0x550   :  { %v520_v29 = vadd.f32 %v517_v28, %v500_v15 }
 0x551   :  { %v1007_v30 = vpop.eup %1006 }
 0x552   :  { %v522_v31 = vsub.f32 %v496_v9, %v520_v29  ;;  %v519_v32 = vmul.f32 0.6931472, %v1007_v30 }
 0x554   :  { %v524_v33 = vsel %vm361_vm2, %v522_v31, -inf  ;;  %v521_v34 = vadd.f32 %v519_v32, %v503_v18 }
 0x555   :  { %v525_v35 = vrot.slane %v524_v33, 4 }
 0x556   :  { %v523_v36 = vsub.f32 %v497_v13, %v521_v34 }
 0x557   :  { %v526_v37 = vmax.f32 %v524_v33, %v525_v35 }
 0x558   :  { %v531_v38 = vsel %vm361_vm2, %v523_v36, -inf }
 0x559   :  { %v532_v39 = vrot.slane %v531_v38, 4  ;;  %v527_v40 = vrot.slane %v526_v37, 2 }
 0x55b   :  { %v528_v41 = vmax.f32 %v526_v37, %v527_v40  ;;  %v533_v42 = vmax.f32 %v531_v38, %v532_v39 }
 0x55d   :  { %v529_v43 = vrot.slane %v528_v41, 1  ;;  %v534_v44 = vrot.slane %v533_v42, 2 }
 0x55f   :  { %v530_v45 = vmax.f32 %v528_v41, %v529_v43  ;;  %v535_v46 = vmax.f32 %v533_v42, %v534_v44 }
 0x561   :  { %v538_v47 = vsub.f32 %v522_v31, %v530_v45  ;;  %v536_v48 = vrot.slane %v535_v46, 1 }
 0x563   :  { %v540_v49 = vmul.f32 1.442695, %v538_v47  ;;  %v537_v50 = vmax.f32 %v535_v46, %v536_v48 }
 0x565   :  { %1008 = vpow2.f32 %v540_v49  ;;  %v539_v51 = vsub.f32 %v523_v36, %v537_v50 }
 0x567   :  { %v542_v52 = vmul.f32 1.442695, %v539_v51 }
 0x569   :  { %1010 = vpow2.f32 %v542_v52 }
 0x572   :  { %v1009_v53 = vpop.eup %1008 }
 0x573   :  { %v544_v54 = vsel %vm361_vm2, %v1009_v53, 0.0 }
 0x574   :  { %v545_v55 = vrot.slane %v544_v54, 4 }
 0x576   :  { %v1011_v56 = vpop.eup %1010  ;;  %v546_v57 = vadd.f32 %v545_v55, %v544_v54 }
 0x577   :  { %v551_v58 = vsel %vm361_vm2, %v1011_v56, 0.0 }
 0x578   :  { %v547_v59 = vrot.slane %v546_v57, 2  ;;  %v552_v60 = vrot.slane %v551_v58, 4 }
 0x57a   :  { %v548_v61 = vadd.f32 %v547_v59, %v546_v57  ;;  %v553_v62 = vadd.f32 %v552_v60, %v551_v58 }
 0x57c   :  { %v549_v63 = vrot.slane %v548_v61, 1  ;;  %v554_v0 = vrot.slane %v553_v62, 2 }
 0x57e   :  { %v550_v1 = vadd.f32 %v549_v63, %v548_v61  ;;  %v555_v2 = vadd.f32 %v554_v0, %v553_v62 }
 0x580   :  { %1012 = vlog2.f32 %v550_v1  ;;  %v556_v3 = vrot.slane %v555_v2, 1 }
 0x582   :  { %v557_v4 = vadd.f32 %v556_v3, %v555_v2 }
 0x584   :  { %1014 = vlog2.f32 %v557_v4 }
 0x58d   :  { %v1013_v5 = vpop.eup %1012 }
 0x58e   :  { %v559_v6 = vmul.f32 0.6931472, %v1013_v5 }
 0x590   :  { %v562_v7 = vadd.f32 %v559_v6, %v530_v45 }
 0x591   :  { %v1015_v8 = vpop.eup %1014 }
 0x592   :  { %v564_v9 = vsub.f32 %v522_v31, %v562_v7  ;;  %v561_v10 = vmul.f32 0.6931472, %v1015_v8 }
 0x594   :  { %v566_v11 = vsel %vm361_vm2, %v564_v9, -inf  ;;  %v563_v12 = vadd.f32 %v561_v10, %v537_v50 }
 0x595   :  { %567 = vmax.xlane.f32.xlu0 %v566_v11 }
 0x596   :  { %v565_v13 = vsub.f32 %v523_v36, %v563_v12 }
 0x598   :  { %v569_v14 = vsel %vm361_vm2, %v565_v13, -inf }
 0x599   :  { %570 = vmax.xlane.f32.xlu1 %v569_v14 }
 0x61e   :  { %v568_v15 = vpop.xlane.xlu0 %567 }
 0x61f   :  { %v572_v16 = vsub.f32 %v564_v9, %v568_v15 }
 0x621   :  { %v574_v17 = vmul.f32 1.442695, %v572_v16 }
 0x622   :  { %v571_v18 = vpop.xlane.xlu1 %570 }
 0x623   :  { %1016 = vpow2.f32 %v574_v17  ;;  %v573_v19 = vsub.f32 %v565_v13, %v571_v18 }
 0x625   :  { %v576_v20 = vmul.f32 1.442695, %v573_v19 }
 0x627   :  { %1018 = vpow2.f32 %v576_v20 }
 0x630   :  { %v1017_v21 = vpop.eup %1016 }
 0x631   :  { %v578_v22 = vsel %vm361_vm2, %v1017_v21, 0.0 }
 0x632   :  { %579 = vadd.xlane.f32.xlu0 %v578_v22 }
 0x634   :  { %v1019_v23 = vpop.eup %1018 }
 0x635   :  { %v581_v24 = vsel %vm361_vm2, %v1019_v23, 0.0 }
 0x636   :  { %582 = vadd.xlane.f32.xlu1 %v581_v24 }
 0x6bb   :  { %v580_v25 = vpop.xlane.xlu0 %579 }
 0x6bc   :  { %1020 = vlog2.f32 %v580_v25 }
 0x6bf   :  { %v583_v26 = vpop.xlane.xlu1 %582 }
 0x6c0   :  { %1022 = vlog2.f32 %v583_v26 }
 0x6c9   :  { %v1021_v27 = vpop.eup %1020 }
 0x6ca   :  { %v585_v28 = vmul.f32 0.6931472, %v1021_v27 }
 0x6cc   :  { %v588_v29 = vadd.f32 %v585_v28, %v568_v15 }
 0x6cd   :  { %v1023_v30 = vpop.eup %1022 }
 0x6ce   :  { %v590_v31 = vsub.f32 %v564_v9, %v588_v29  ;;  %v587_v32 = vmul.f32 0.6931472, %v1023_v30 }
 0x6d0   :  { %v592_v33 = vsel %vm361_vm2, %v590_v31, -inf  ;;  %v589_v34 = vadd.f32 %v587_v32, %v571_v18 }
 0x6d1   :  { %v593_v35 = vrot.slane %v592_v33, 4 }
 0x6d2   :  { %v591_v36 = vsub.f32 %v565_v13, %v589_v34 }
 0x6d3   :  { %v594_v37 = vmax.f32 %v592_v33, %v593_v35 }
 0x6d4   :  { %v599_v38 = vsel %vm361_vm2, %v591_v36, -inf }
 0x6d5   :  { %v600_v39 = vrot.slane %v599_v38, 4  ;;  %v595_v40 = vrot.slane %v594_v37, 2 }
 0x6d7   :  { %v596_v41 = vmax.f32 %v594_v37, %v595_v40  ;;  %v601_v42 = vmax.f32 %v599_v38, %v600_v39 }
 0x6d9   :  { %v597_v43 = vrot.slane %v596_v41, 1  ;;  %v602_v44 = vrot.slane %v601_v42, 2 }
 0x6db   :  { %v598_v45 = vmax.f32 %v596_v41, %v597_v43  ;;  %v603_v46 = vmax.f32 %v601_v42, %v602_v44 }
 0x6dd   :  { %v606_v47 = vsub.f32 %v590_v31, %v598_v45  ;;  %v604_v48 = vrot.slane %v603_v46, 1 }
 0x6df   :  { %v608_v49 = vmul.f32 1.442695, %v606_v47  ;;  %v605_v50 = vmax.f32 %v603_v46, %v604_v48 }
 0x6e1   :  { %1024 = vpow2.f32 %v608_v49  ;;  %v607_v51 = vsub.f32 %v591_v36, %v605_v50 }
 0x6e3   :  { %v610_v52 = vmul.f32 1.442695, %v607_v51 }
 0x6e5   :  { %1026 = vpow2.f32 %v610_v52 }
 0x6ee   :  { %v1025_v53 = vpop.eup %1024 }
 0x6ef   :  { %v612_v54 = vsel %vm361_vm2, %v1025_v53, 0.0 }
 0x6f0   :  { %v613_v55 = vrot.slane %v612_v54, 4 }
 0x6f2   :  { %v1027_v56 = vpop.eup %1026  ;;  %v614_v57 = vadd.f32 %v613_v55, %v612_v54 }
 0x6f3   :  { %v619_v58 = vsel %vm361_vm2, %v1027_v56, 0.0 }
 0x6f4   :  { %v615_v59 = vrot.slane %v614_v57, 2  ;;  %v620_v60 = vrot.slane %v619_v58, 4 }
 0x6f6   :  { %v616_v61 = vadd.f32 %v615_v59, %v614_v57  ;;  %v621_v62 = vadd.f32 %v620_v60, %v619_v58 }
 0x6f8   :  { %v617_v63 = vrot.slane %v616_v61, 1  ;;  %v622_v0 = vrot.slane %v621_v62, 2 }
 0x6fa   :  { %v618_v1 = vadd.f32 %v617_v63, %v616_v61  ;;  %v623_v2 = vadd.f32 %v622_v0, %v621_v62 }
 0x6fc   :  { %1028 = vlog2.f32 %v618_v1  ;;  %v624_v3 = vrot.slane %v623_v2, 1 }
 0x6fe   :  { %v625_v4 = vadd.f32 %v624_v3, %v623_v2 }
 0x700   :  { %1030 = vlog2.f32 %v625_v4 }
 0x709   :  { %v1029_v5 = vpop.eup %1028 }
 0x70a   :  { %v627_v6 = vmul.f32 0.6931472, %v1029_v5 }
 0x70c   :  { %v630_v7 = vadd.f32 %v627_v6, %v598_v45 }
 0x70d   :  { %v1031_v8 = vpop.eup %1030 }
 0x70e   :  { %v632_v9 = vsub.f32 %v590_v31, %v630_v7  ;;  %v629_v10 = vmul.f32 0.6931472, %v1031_v8 }
 0x710   :  { %v634_v11 = vsel %vm361_vm2, %v632_v9, -inf  ;;  %v631_v12 = vadd.f32 %v629_v10, %v605_v50 }
 0x711   :  { %635 = vmax.xlane.f32.xlu0 %v634_v11 }
 0x712   :  { %v633_v13 = vsub.f32 %v591_v36, %v631_v12 }
 0x714   :  { %v637_v14 = vsel %vm361_vm2, %v633_v13, -inf }
 0x715   :  { %638 = vmax.xlane.f32.xlu1 %v637_v14 }
 0x79a   :  { %v636_v15 = vpop.xlane.xlu0 %635 }
 0x79b   :  { %v640_v16 = vsub.f32 %v632_v9, %v636_v15 }
 0x79d   :  { %v642_v17 = vmul.f32 1.442695, %v640_v16 }
 0x79e   :  { %v639_v18 = vpop.xlane.xlu1 %638 }
 0x79f   :  { %1032 = vpow2.f32 %v642_v17  ;;  %v641_v19 = vsub.f32 %v633_v13, %v639_v18 }
 0x7a1   :  { %v644_v20 = vmul.f32 1.442695, %v641_v19 }
 0x7a3   :  { %1034 = vpow2.f32 %v644_v20 }
 0x7ac   :  { %v1033_v21 = vpop.eup %1032 }
 0x7ad   :  { %v646_v22 = vsel %vm361_vm2, %v1033_v21, 0.0 }
 0x7ae   :  { %647 = vadd.xlane.f32.xlu0 %v646_v22 }
 0x7b0   :  { %v1035_v23 = vpop.eup %1034 }
 0x7b1   :  { %v649_v24 = vsel %vm361_vm2, %v1035_v23, 0.0 }
 0x7b2   :  { %650 = vadd.xlane.f32.xlu1 %v649_v24 }
 0x837   :  { %v648_v25 = vpop.xlane.xlu0 %647 }
 0x838   :  { %1036 = vlog2.f32 %v648_v25 }
 0x83b   :  { %v651_v26 = vpop.xlane.xlu1 %650 }
 0x83c   :  { %1038 = vlog2.f32 %v651_v26 }
 0x845   :  { %v1037_v27 = vpop.eup %1036 }
 0x846   :  { %v653_v28 = vmul.f32 0.6931472, %v1037_v27 }
 0x848   :  { %v656_v29 = vadd.f32 %v653_v28, %v636_v15 }
 0x849   :  { %v1039_v30 = vpop.eup %1038 }
 0x84a   :  { %v658_v31 = vsub.f32 %v632_v9, %v656_v29  ;;  %v655_v32 = vmul.f32 0.6931472, %v1039_v30 }
 0x84c   :  { %v660_v33 = vsel %vm361_vm2, %v658_v31, -inf  ;;  %v657_v34 = vadd.f32 %v655_v32, %v639_v18 }
 0x84d   :  { %v661_v35 = vrot.slane %v660_v33, 4 }
 0x84e   :  { %v659_v36 = vsub.f32 %v633_v13, %v657_v34 }
 0x84f   :  { %v662_v37 = vmax.f32 %v660_v33, %v661_v35 }
 0x850   :  { %v667_v38 = vsel %vm361_vm2, %v659_v36, -inf }
 0x851   :  { %v668_v39 = vrot.slane %v667_v38, 4  ;;  %v663_v40 = vrot.slane %v662_v37, 2 }
 0x853   :  { %v664_v41 = vmax.f32 %v662_v37, %v663_v40  ;;  %v669_v42 = vmax.f32 %v667_v38, %v668_v39 }
 0x855   :  { %v665_v43 = vrot.slane %v664_v41, 1  ;;  %v670_v44 = vrot.slane %v669_v42, 2 }
 0x857   :  { %v666_v45 = vmax.f32 %v664_v41, %v665_v43  ;;  %v671_v46 = vmax.f32 %v669_v42, %v670_v44 }
 0x859   :  { %v674_v47 = vsub.f32 %v658_v31, %v666_v45  ;;  %v672_v48 = vrot.slane %v671_v46, 1 }
 0x85b   :  { %v676_v49 = vmul.f32 1.442695, %v674_v47  ;;  %v673_v50 = vmax.f32 %v671_v46, %v672_v48 }
 0x85d   :  { %1040 = vpow2.f32 %v676_v49  ;;  %v675_v51 = vsub.f32 %v659_v36, %v673_v50 }
 0x85f   :  { %v678_v52 = vmul.f32 1.442695, %v675_v51 }
 0x861   :  { %1042 = vpow2.f32 %v678_v52 }
 0x86a   :  { %v1041_v53 = vpop.eup %1040 }
 0x86b   :  { %v680_v54 = vsel %vm361_vm2, %v1041_v53, 0.0 }
 0x86c   :  { %v681_v55 = vrot.slane %v680_v54, 4 }
 0x86e   :  { %v1043_v56 = vpop.eup %1042  ;;  %v682_v57 = vadd.f32 %v681_v55, %v680_v54 }
 0x86f   :  { %v687_v58 = vsel %vm361_vm2, %v1043_v56, 0.0 }
 0x870   :  { %v683_v59 = vrot.slane %v682_v57, 2  ;;  %v688_v60 = vrot.slane %v687_v58, 4 }
 0x872   :  { %v684_v61 = vadd.f32 %v683_v59, %v682_v57  ;;  %v689_v62 = vadd.f32 %v688_v60, %v687_v58 }
 0x874   :  { %v685_v63 = vrot.slane %v684_v61, 1  ;;  %v690_v0 = vrot.slane %v689_v62, 2 }
 0x876   :  { %v686_v1 = vadd.f32 %v685_v63, %v684_v61  ;;  %v691_v2 = vadd.f32 %v690_v0, %v689_v62 }
 0x878   :  { %1044 = vlog2.f32 %v686_v1  ;;  %v692_v3 = vrot.slane %v691_v2, 1 }
 0x87a   :  { %v693_v4 = vadd.f32 %v692_v3, %v691_v2 }
 0x87c   :  { %1046 = vlog2.f32 %v693_v4 }
 0x885   :  { %v1045_v5 = vpop.eup %1044 }
 0x886   :  { %v695_v6 = vmul.f32 0.6931472, %v1045_v5 }
 0x888   :  { %v698_v7 = vadd.f32 %v695_v6, %v666_v45 }
 0x889   :  { %v1047_v8 = vpop.eup %1046 }
 0x88a   :  { %v700_v9 = vsub.f32 %v658_v31, %v698_v7  ;;  %v697_v10 = vmul.f32 0.6931472, %v1047_v8 }
 0x88c   :  { %v702_v11 = vsel %vm361_vm2, %v700_v9, -inf  ;;  %v699_v12 = vadd.f32 %v697_v10, %v673_v50 }
 0x88d   :  { %703 = vmax.xlane.f32.xlu0 %v702_v11 }
 0x88e   :  { %v701_v13 = vsub.f32 %v659_v36, %v699_v12 }
 0x890   :  { %v705_v14 = vsel %vm361_vm2, %v701_v13, -inf }
 0x891   :  { %706 = vmax.xlane.f32.xlu1 %v705_v14 }
 0x916   :  { %v704_v15 = vpop.xlane.xlu0 %703 }
 0x917   :  { %v708_v16 = vsub.f32 %v700_v9, %v704_v15 }
 0x919   :  { %v710_v17 = vmul.f32 1.442695, %v708_v16 }
 0x91a   :  { %v707_v18 = vpop.xlane.xlu1 %706 }
 0x91b   :  { %1048 = vpow2.f32 %v710_v17  ;;  %v709_v19 = vsub.f32 %v701_v13, %v707_v18 }
 0x91d   :  { %v712_v20 = vmul.f32 1.442695, %v709_v19 }
 0x91f   :  { %1050 = vpow2.f32 %v712_v20 }
 0x928   :  { %v1049_v21 = vpop.eup %1048 }
 0x929   :  { %v714_v22 = vsel %vm361_vm2, %v1049_v21, 0.0 }
 0x92a   :  { %715 = vadd.xlane.f32.xlu0 %v714_v22 }
 0x92c   :  { %v1051_v23 = vpop.eup %1050 }
 0x92d   :  { %v717_v24 = vsel %vm361_vm2, %v1051_v23, 0.0 }
 0x92e   :  { %718 = vadd.xlane.f32.xlu1 %v717_v24 }
 0x9b3   :  { %v716_v25 = vpop.xlane.xlu0 %715 }
 0x9b4   :  { %1052 = vlog2.f32 %v716_v25 }
 0x9b7   :  { %v719_v26 = vpop.xlane.xlu1 %718 }
 0x9b8   :  { %1054 = vlog2.f32 %v719_v26 }
 0x9c1   :  { %v1053_v27 = vpop.eup %1052 }
 0x9c2   :  { %v721_v28 = vmul.f32 0.6931472, %v1053_v27 }
 0x9c4   :  { %v724_v29 = vadd.f32 %v721_v28, %v704_v15 }
 0x9c5   :  { %v1055_v30 = vpop.eup %1054 }
 0x9c6   :  { %v726_v31 = vsub.f32 %v700_v9, %v724_v29  ;;  %v723_v32 = vmul.f32 0.6931472, %v1055_v30 }
 0x9c8   :  { %v728_v33 = vsel %vm361_vm2, %v726_v31, -inf  ;;  %v725_v34 = vadd.f32 %v723_v32, %v707_v18 }
 0x9c9   :  { %v729_v35 = vrot.slane %v728_v33, 4 }
 0x9ca   :  { %v727_v36 = vsub.f32 %v701_v13, %v725_v34 }
 0x9cb   :  { %v730_v37 = vmax.f32 %v728_v33, %v729_v35 }
 0x9cc   :  { %v735_v38 = vsel %vm361_vm2, %v727_v36, -inf }
 0x9cd   :  { %v736_v39 = vrot.slane %v735_v38, 4  ;;  %v731_v40 = vrot.slane %v730_v37, 2 }
 0x9cf   :  { %v732_v41 = vmax.f32 %v730_v37, %v731_v40  ;;  %v737_v42 = vmax.f32 %v735_v38, %v736_v39 }
 0x9d1   :  { %v733_v43 = vrot.slane %v732_v41, 1  ;;  %v738_v44 = vrot.slane %v737_v42, 2 }
 0x9d3   :  { %v734_v45 = vmax.f32 %v732_v41, %v733_v43  ;;  %v739_v46 = vmax.f32 %v737_v42, %v738_v44 }
 0x9d5   :  { %v742_v47 = vsub.f32 %v726_v31, %v734_v45  ;;  %v740_v48 = vrot.slane %v739_v46, 1 }
 0x9d7   :  { %v744_v49 = vmul.f32 1.442695, %v742_v47  ;;  %v741_v50 = vmax.f32 %v739_v46, %v740_v48 }
 0x9d9   :  { %1056 = vpow2.f32 %v744_v49  ;;  %v743_v51 = vsub.f32 %v727_v36, %v741_v50 }
 0x9db   :  { %v746_v52 = vmul.f32 1.442695, %v743_v51 }
 0x9dd   :  { %1058 = vpow2.f32 %v746_v52 }
 0x9e6   :  { %v1057_v53 = vpop.eup %1056 }
 0x9e7   :  { %v748_v54 = vsel %vm361_vm2, %v1057_v53, 0.0 }
 0x9e8   :  { %v749_v55 = vrot.slane %v748_v54, 4 }
 0x9ea   :  { %v1059_v56 = vpop.eup %1058  ;;  %v750_v57 = vadd.f32 %v749_v55, %v748_v54 }
 0x9eb   :  { %v755_v58 = vsel %vm361_vm2, %v1059_v56, 0.0 }
 0x9ec   :  { %v751_v59 = vrot.slane %v750_v57, 2  ;;  %v756_v60 = vrot.slane %v755_v58, 4 }
 0x9ee   :  { %v752_v61 = vadd.f32 %v751_v59, %v750_v57  ;;  %v757_v62 = vadd.f32 %v756_v60, %v755_v58 }
 0x9f0   :  { %v753_v63 = vrot.slane %v752_v61, 1  ;;  %v758_v0 = vrot.slane %v757_v62, 2 }
 0x9f2   :  { %v754_v1 = vadd.f32 %v753_v63, %v752_v61  ;;  %v759_v2 = vadd.f32 %v758_v0, %v757_v62 }
 0x9f4   :  { %1060 = vlog2.f32 %v754_v1  ;;  %v760_v3 = vrot.slane %v759_v2, 1 }
 0x9f6   :  { %v761_v4 = vadd.f32 %v760_v3, %v759_v2 }
 0x9f8   :  { %1062 = vlog2.f32 %v761_v4 }
 0xa01   :  { %v1061_v5 = vpop.eup %1060 }
 0xa02   :  { %v763_v6 = vmul.f32 0.6931472, %v1061_v5 }
 0xa04   :  { %v766_v7 = vadd.f32 %v763_v6, %v734_v45 }
 0xa05   :  { %v1063_v8 = vpop.eup %1062 }
 0xa06   :  { %v768_v9 = vsub.f32 %v726_v31, %v766_v7  ;;  %v765_v10 = vmul.f32 0.6931472, %v1063_v8 }
 0xa08   :  { %v770_v11 = vsel %vm361_vm2, %v768_v9, -inf  ;;  %v767_v12 = vadd.f32 %v765_v10, %v741_v50 }
 0xa09   :  { %771 = vmax.xlane.f32.xlu0 %v770_v11 }
 0xa0a   :  { %v769_v13 = vsub.f32 %v727_v36, %v767_v12 }
 0xa0c   :  { %v773_v14 = vsel %vm361_vm2, %v769_v13, -inf }
 0xa0d   :  { %774 = vmax.xlane.f32.xlu1 %v773_v14 }
 0xa92   :  { %v772_v15 = vpop.xlane.xlu0 %771 }
 0xa93   :  { %v776_v16 = vsub.f32 %v768_v9, %v772_v15 }
 0xa95   :  { %v778_v17 = vmul.f32 1.442695, %v776_v16 }
 0xa96   :  { %v775_v18 = vpop.xlane.xlu1 %774 }
 0xa97   :  { %1064 = vpow2.f32 %v778_v17  ;;  %v777_v19 = vsub.f32 %v769_v13, %v775_v18 }
 0xa99   :  { %v780_v20 = vmul.f32 1.442695, %v777_v19 }
 0xa9b   :  { %1066 = vpow2.f32 %v780_v20 }
 0xaa4   :  { %v1065_v21 = vpop.eup %1064 }
 0xaa5   :  { %v782_v22 = vsel %vm361_vm2, %v1065_v21, 0.0 }
 0xaa6   :  { %783 = vadd.xlane.f32.xlu0 %v782_v22 }
 0xaa8   :  { %v1067_v23 = vpop.eup %1066 }
 0xaa9   :  { %v785_v24 = vsel %vm361_vm2, %v1067_v23, 0.0 }
 0xaaa   :  { %786 = vadd.xlane.f32.xlu1 %v785_v24 }
 0xb2f   :  { %v784_v25 = vpop.xlane.xlu0 %783 }
 0xb30   :  { %1068 = vlog2.f32 %v784_v25 }
 0xb33   :  { %v787_v26 = vpop.xlane.xlu1 %786 }
 0xb34   :  { %1070 = vlog2.f32 %v787_v26 }
 0xb3d   :  { %v1069_v27 = vpop.eup %1068 }
 0xb3e   :  { %v789_v28 = vmul.f32 0.6931472, %v1069_v27 }
 0xb40   :  { %v792_v29 = vadd.f32 %v789_v28, %v772_v15 }
 0xb41   :  { %v1071_v30 = vpop.eup %1070 }
 0xb42   :  { %v794_v31 = vsub.f32 %v768_v9, %v792_v29  ;;  %v791_v32 = vmul.f32 0.6931472, %v1071_v30 }
 0xb44   :  { %v796_v33 = vsel %vm361_vm2, %v794_v31, -inf  ;;  %v793_v34 = vadd.f32 %v791_v32, %v775_v18 }
 0xb45   :  { %v797_v35 = vrot.slane %v796_v33, 4 }
 0xb46   :  { %v795_v36 = vsub.f32 %v769_v13, %v793_v34 }
 0xb47   :  { %v798_v37 = vmax.f32 %v796_v33, %v797_v35 }
 0xb48   :  { %v803_v38 = vsel %vm361_vm2, %v795_v36, -inf }
 0xb49   :  { %v804_v39 = vrot.slane %v803_v38, 4  ;;  %v799_v40 = vrot.slane %v798_v37, 2 }
 0xb4b   :  { %v800_v41 = vmax.f32 %v798_v37, %v799_v40  ;;  %v805_v42 = vmax.f32 %v803_v38, %v804_v39 }
 0xb4d   :  { %v801_v43 = vrot.slane %v800_v41, 1  ;;  %v806_v44 = vrot.slane %v805_v42, 2 }
 0xb4f   :  { %v802_v45 = vmax.f32 %v800_v41, %v801_v43  ;;  %v807_v46 = vmax.f32 %v805_v42, %v806_v44 }
 0xb51   :  { %v810_v47 = vsub.f32 %v794_v31, %v802_v45  ;;  %v808_v48 = vrot.slane %v807_v46, 1 }
 0xb53   :  { %v812_v49 = vmul.f32 1.442695, %v810_v47  ;;  %v809_v50 = vmax.f32 %v807_v46, %v808_v48 }
 0xb55   :  { %1072 = vpow2.f32 %v812_v49  ;;  %v811_v51 = vsub.f32 %v795_v36, %v809_v50 }
 0xb57   :  { %v814_v52 = vmul.f32 1.442695, %v811_v51 }
 0xb59   :  { %1074 = vpow2.f32 %v814_v52 }
 0xb62   :  { %v1073_v53 = vpop.eup %1072 }
 0xb63   :  { %v816_v54 = vsel %vm361_vm2, %v1073_v53, 0.0 }
 0xb64   :  { %v817_v55 = vrot.slane %v816_v54, 4 }
 0xb66   :  { %v1075_v56 = vpop.eup %1074  ;;  %v818_v57 = vadd.f32 %v817_v55, %v816_v54 }
 0xb67   :  { %v823_v58 = vsel %vm361_vm2, %v1075_v56, 0.0 }
 0xb68   :  { %v819_v59 = vrot.slane %v818_v57, 2  ;;  %v824_v60 = vrot.slane %v823_v58, 4 }
 0xb6a   :  { %v820_v61 = vadd.f32 %v819_v59, %v818_v57  ;;  %v825_v62 = vadd.f32 %v824_v60, %v823_v58 }
 0xb6c   :  { %v821_v63 = vrot.slane %v820_v61, 1  ;;  %v826_v0 = vrot.slane %v825_v62, 2 }
 0xb6e   :  { %v822_v1 = vadd.f32 %v821_v63, %v820_v61  ;;  %v827_v2 = vadd.f32 %v826_v0, %v825_v62 }
 0xb70   :  { %1076 = vlog2.f32 %v822_v1  ;;  %v828_v3 = vrot.slane %v827_v2, 1 }
 0xb72   :  { %v829_v4 = vadd.f32 %v828_v3, %v827_v2 }
 0xb74   :  { %1078 = vlog2.f32 %v829_v4 }
 0xb7d   :  { %v1077_v5 = vpop.eup %1076 }
 0xb7e   :  { %v831_v6 = vmul.f32 0.6931472, %v1077_v5 }
 0xb80   :  { %v834_v7 = vadd.f32 %v831_v6, %v802_v45 }
 0xb81   :  { %v1079_v8 = vpop.eup %1078 }
 0xb82   :  { %v836_v9 = vsub.f32 %v794_v31, %v834_v7  ;;  %v833_v10 = vmul.f32 0.6931472, %v1079_v8 }
 0xb84   :  { %v838_v11 = vsel %vm361_vm2, %v836_v9, -inf  ;;  %v835_v12 = vadd.f32 %v833_v10, %v809_v50 }
 0xb85   :  { %839 = vmax.xlane.f32.xlu0 %v838_v11 }
 0xb86   :  { %v837_v13 = vsub.f32 %v795_v36, %v835_v12 }
 0xb88   :  { %v841_v14 = vsel %vm361_vm2, %v837_v13, -inf }
 0xb89   :  { %842 = vmax.xlane.f32.xlu1 %v841_v14 }
 0xc0e   :  { %v840_v15 = vpop.xlane.xlu0 %839 }
 0xc0f   :  { %v844_v16 = vsub.f32 %v836_v9, %v840_v15 }
 0xc11   :  { %v846_v17 = vmul.f32 1.442695, %v844_v16 }
 0xc12   :  { %v843_v18 = vpop.xlane.xlu1 %842 }
 0xc13   :  { %1080 = vpow2.f32 %v846_v17  ;;  %v845_v19 = vsub.f32 %v837_v13, %v843_v18 }
 0xc15   :  { %v848_v20 = vmul.f32 1.442695, %v845_v19 }
 0xc17   :  { %1082 = vpow2.f32 %v848_v20 }
 0xc20   :  { %v1081_v21 = vpop.eup %1080 }
 0xc21   :  { %v850_v22 = vsel %vm361_vm2, %v1081_v21, 0.0 }
 0xc22   :  { %851 = vadd.xlane.f32.xlu0 %v850_v22 }
 0xc24   :  { %v1083_v23 = vpop.eup %1082 }
 0xc25   :  { %v853_v24 = vsel %vm361_vm2, %v1083_v23, 0.0 }
 0xc26   :  { %854 = vadd.xlane.f32.xlu1 %v853_v24 }
 0xcab   :  { %v852_v25 = vpop.xlane.xlu0 %851 }
 0xcac   :  { %1084 = vlog2.f32 %v852_v25 }
 0xcaf   :  { %v855_v26 = vpop.xlane.xlu1 %854 }
 0xcb0   :  { %1086 = vlog2.f32 %v855_v26 }
 0xcb9   :  { %v1085_v27 = vpop.eup %1084 }
 0xcba   :  { %v857_v28 = vmul.f32 0.6931472, %v1085_v27 }
 0xcbc   :  { %v860_v29 = vadd.f32 %v857_v28, %v840_v15 }
 0xcbd   :  { %v1087_v30 = vpop.eup %1086 }
 0xcbe   :  { %v862_v31 = vsub.f32 %v836_v9, %v860_v29  ;;  %v859_v32 = vmul.f32 0.6931472, %v1087_v30 }
 0xcc0   :  { %v864_v33 = vsel %vm361_vm2, %v862_v31, -inf  ;;  %v861_v34 = vadd.f32 %v859_v32, %v843_v18 }
 0xcc1   :  { %v865_v35 = vrot.slane %v864_v33, 4 }
 0xcc2   :  { %v863_v36 = vsub.f32 %v837_v13, %v861_v34 }
 0xcc3   :  { %v866_v37 = vmax.f32 %v864_v33, %v865_v35 }
 0xcc4   :  { %v871_v38 = vsel %vm361_vm2, %v863_v36, -inf }
 0xcc5   :  { %v867_v39 = vrot.slane %v866_v37, 2  ;;  %v872_v40 = vrot.slane %v871_v38, 4 }
 0xcc7   :  { %v868_v41 = vmax.f32 %v866_v37, %v867_v39  ;;  %v873_v42 = vmax.f32 %v871_v38, %v872_v40 }
 0xcc9   :  { %v869_v43 = vrot.slane %v868_v41, 1  ;;  %v874_v44 = vrot.slane %v873_v42, 2 }
 0xccb   :  { %v870_v45 = vmax.f32 %v868_v41, %v869_v43  ;;  %v875_v46 = vmax.f32 %v873_v42, %v874_v44 }
 0xccd   :  { %v878_v47 = vsub.f32 %v862_v31, %v870_v45  ;;  %v876_v48 = vrot.slane %v875_v46, 1 }
 0xccf   :  { %v880_v49 = vmul.f32 1.442695, %v878_v47  ;;  %v877_v50 = vmax.f32 %v875_v46, %v876_v48 }
 0xcd1   :  { %1088 = vpow2.f32 %v880_v49  ;;  %v879_v51 = vsub.f32 %v863_v36, %v877_v50 }
 0xcd3   :  { %v882_v52 = vmul.f32 1.442695, %v879_v51 }
 0xcd5   :  { %1090 = vpow2.f32 %v882_v52 }
 0xcde   :  { %v1089_v53 = vpop.eup %1088 }
 0xcdf   :  { %v884_v54 = vsel %vm361_vm2, %v1089_v53, 0.0 }
 0xce0   :  { %v885_v55 = vrot.slane %v884_v54, 4 }
 0xce2   :  { %v1091_v56 = vpop.eup %1090  ;;  %v886_v57 = vadd.f32 %v885_v55, %v884_v54 }
 0xce3   :  { %v891_v58 = vsel %vm361_vm2, %v1091_v56, 0.0 }
 0xce4   :  { %v887_v59 = vrot.slane %v886_v57, 2  ;;  %v892_v60 = vrot.slane %v891_v58, 4 }
 0xce6   :  { %v888_v61 = vadd.f32 %v887_v59, %v886_v57  ;;  %v893_v62 = vadd.f32 %v892_v60, %v891_v58 }
 0xce8   :  { %v889_v63 = vrot.slane %v888_v61, 1  ;;  %v894_v0 = vrot.slane %v893_v62, 2 }
 0xcea   :  { %v890_v1 = vadd.f32 %v889_v63, %v888_v61  ;;  %v895_v2 = vadd.f32 %v894_v0, %v893_v62 }
 0xcec   :  { %1092 = vlog2.f32 %v890_v1  ;;  %v896_v3 = vrot.slane %v895_v2, 1 }
 0xcee   :  { %v897_v4 = vadd.f32 %v896_v3, %v895_v2 }
 0xcf0   :  { %1094 = vlog2.f32 %v897_v4 }
 0xcf9   :  { %v1093_v5 = vpop.eup %1092 }
 0xcfa   :  { %v899_v6 = vmul.f32 0.6931472, %v1093_v5 }
 0xcfc   :  { %v902_v7 = vadd.f32 %v899_v6, %v870_v45 }
 0xcfd   :  { %v1095_v8 = vpop.eup %1094 }
 0xcfe   :  { %v904_v9 = vsub.f32 %v862_v31, %v902_v7  ;;  %v901_v10 = vmul.f32 0.6931472, %v1095_v8 }
 0xd00   :  { %v906_v11 = vmul.f32 1.442695, %v904_v9  ;;  %v903_v12 = vadd.f32 %v901_v10, %v877_v50 }
 0xd02   :  { %1096 = vpow2.f32 %v906_v11  ;;  %v905_v13 = vsub.f32 %v863_v36, %v903_v12 }
 0xd04   :  { %v908_v14 = vmul.f32 1.442695, %v905_v13 }
 0xd06   :  { %1098 = vpow2.f32 %v908_v14 }
 0xd0f   :  { %v1097_v15 = vpop.eup %1096 }
 0xd10   :  { %910 = vst.msk [vmem:[#allocation10] sm:$0xff] %vm361_vm2, %v1097_v15 }
 0xd13   :  { %v1099_v16 = vpop.eup %1098 }
 0xd14   :  { %911 = vst.msk [vmem:[#allocation10 + $0x8] sm:$0xff] %vm361_vm2, %v1099_v16 }
 0xd15   :  { %1171 = shalt.err (!%p1168_p5)
}
 0xd16   :  { %923 = dma.vmem_to_hbm [thread:$0]  %s918_s2, 256, %s1351_s3, [#allocation6], %s1188_s17, %s1188_s17, %s1189_s18  }
 0xd17   :  { %1184 = dma.done.wait [#allocation6], 256  }
 0xd18   :  { %1185 = vsyncadd [#allocation6], 4294967040 }
 0xd19   :  { %927 = vsyncpa [#allocation5], 1 }
 0xd1a   :  { %928 = vsyncpa [#allocation8], 1 }
 0xd1b   :  { %929 = vsyncpa [#allocation6], 1 }

</bundles_post_ra>
